<compile_context>
chip_gen: v7x
topology: tpu7x:2x2x1
jax: 0.10.0
libtpu: 0.0.40
codegen_flags: <defaults>
</compile_context>

<pallas_src>
import functools

import jax
import jax.numpy as jnp
from jax.experimental import pallas as pl
from jax.experimental.pallas import tpu as pltpu


# ----------------------------------------------------------------------------
# Pallas kernels
# ----------------------------------------------------------------------------
def _fused_conv_bn_act_kernel(*refs, n_in, nt, tn, act, slope, count, eps, parity):
    """conv-as-matmul (split-K over `n_in` input slabs) + train-mode BatchNorm
    + activation, fused in one kernel.

    refs = w_0..w_{n-1} (C, K_i) bf16, gamma (Cg, 1) f32, beta (Cg, 1) f32,
           p_0..p_{n-1} (K_i, tn) bf16, out (C, M_pad) bf16 [, y_scratch f32].
    """
    w_refs = refs[:n_in]
    g_ref = refs[n_in]
    b_ref = refs[n_in + 1]
    p_refs = refs[n_in + 2:2 * n_in + 2]
    o_ref = refs[2 * n_in + 2]
    y_scr = refs[2 * n_in + 3] if nt > 1 else None

    # MXU: bf16 inputs, f32 accumulation.  Split-K over the input parts keeps
    # the skip-connection concat out of HBM (dots accumulate in registers).
    y = jnp.dot(w_refs[0][...], p_refs[0][...], preferred_element_type=jnp.float32)
    for t in range(1, n_in):
        y = y + jnp.dot(w_refs[t][...], p_refs[t][...],
                        preferred_element_type=jnp.float32)

    def finalize(yf):
        # Per-channel batch stats from the f32 accumulator.  Padded lane
        # columns are exactly zero (no conv bias) so they contribute nothing.
        s1 = jnp.sum(yf, axis=1, keepdims=True)            # (C, 1)
        s2 = jnp.sum(yf * yf, axis=1, keepdims=True)       # (C, 1)
        cg = s1.shape[0] // parity
        if parity > 1:                                     # merge deconv parities
            s1 = sum(s1[g * cg:(g + 1) * cg] for g in range(parity))
            s2 = sum(s2[g * cg:(g + 1) * cg] for g in range(parity))
        inv_n = 1.0 / count
        mean = s1 * inv_n
        var = jnp.maximum(s2 * inv_n - mean * mean, 0.0)   # biased var (PyTorch train)
        scale = g_ref[...] * jax.lax.rsqrt(var + eps)      # (Cg, 1)
        shift = b_ref[...] - mean * scale
        for g in range(parity):
            z = yf[g * cg:(g + 1) * cg] * scale + shift
            if act == "leaky_relu":
                z = jnp.where(z >= 0, z, slope * z)
            else:
                z = jnp.maximum(z, 0.0)
            if parity == 1:
                o_ref[...] = z.astype(o_ref.dtype)
            else:
                # cg is a multiple of 8 -> sublane-aligned static stores.
                o_ref[g * cg:(g + 1) * cg, :] = z.astype(o_ref.dtype)

    if nt == 1:
        # Whole activation slab in one lane-dense block: BN + act run right
        # behind the matmul, no intermediate f32 slab ever hits HBM.
        finalize(y)
    else:
        # TODO(synk): multi-tile fallback for slabs wider than one lane tile:
        # park f32 tiles in VMEM scratch and finalize on the last step.
        i = pl.program_id(0)
        y_scr[:, pl.ds(pl.multiple_of(i * tn, 128), tn)] = y

        @pl.when(i == nt - 1)
        def _():
            finalize(y_scr[...])


def _final_conv_bias_tanh_kernel(*refs, n_in):
    # Final 1x1 conv: split-K matmul + bias with tanh fused in the epilogue.
    w_refs = refs[:n_in]
    b_ref = refs[n_in]
    p_refs = refs[n_in + 1:2 * n_in + 1]
    o_ref = refs[2 * n_in + 1]
    y = jnp.dot(w_refs[0][...], p_refs[0][...], preferred_element_type=jnp.float32)
    for t in range(1, n_in):
        y = y + jnp.dot(w_refs[t][...], p_refs[t][...],
                        preferred_element_type=jnp.float32)
    o_ref[...] = jnp.tanh(y + b_ref[...])


# ----------------------------------------------------------------------------
# Pallas wrappers
# ----------------------------------------------------------------------------
def _pick_tile(m_pad, k_total):
    """Lane-tile policy (perf feedback): fewer, wider grid steps.  One block
    whenever the streamed (double-buffered) bf16 patch tiles fit a conservative
    VMEM budget sized against v7x's 32 MiB scoped default; otherwise the widest
    128-multiple tile that divides M_pad."""
    budget = 8 * 1024 * 1024
    max_tn = max(128, (budget // max(4 * k_total, 1)) // 128 * 128)
    if m_pad <= max_tn:
        return m_pad, 1
    tn = max_tn
    while m_pad % tn:
        tn -= 128
    return tn, m_pad // tn


def fused_conv_bn_act(wmats, gamma, beta, patch_parts, m_true, *, act, parity,
                      slope=0.2, eps=1e-5):
    """Fused (sum_i W_i @ P_i) -> train-mode BN -> activation, bf16 output."""
    c = wmats[0].shape[0]
    cg = c // parity
    m_pad = patch_parts[0].shape[1]
    k_total = sum(w.shape[1] for w in wmats)
    tn, nt = _pick_tile(m_pad, k_total)
    n_in = len(wmats)
    kern = functools.partial(
        _fused_conv_bn_act_kernel, n_in=n_in, nt=nt, tn=tn, act=act, slope=slope,
        count=float(parity * m_true), eps=eps, parity=parity)
    in_specs = [pl.BlockSpec(w.shape, lambda i: (0, 0)) for w in wmats]
    in_specs += [pl.BlockSpec((cg, 1), lambda i: (0, 0)),
                 pl.BlockSpec((cg, 1), lambda i: (0, 0))]
    in_specs += [pl.BlockSpec((p.shape[0], tn), lambda i: (0, i)) for p in patch_parts]
    scratch = [pltpu.VMEM((c, m_pad), jnp.float32)] if nt > 1 else []
    return pl.pallas_call(
        kern,
        out_shape=jax.ShapeDtypeStruct((c, m_pad), jnp.bfloat16),
        grid=(nt,),
        in_specs=in_specs,
        out_specs=pl.BlockSpec((c, m_pad), lambda i: (0, 0)),
        scratch_shapes=scratch,
        compiler_params=pltpu.CompilerParams(dimension_semantics=("arbitrary",)),
    )(*wmats, gamma, beta, *patch_parts)


def final_conv_bias_tanh(wmats, bias, patch_parts):
    m_pad = patch_parts[0].shape[1]
    k_total = sum(w.shape[1] for w in wmats)
    tn, nt = _pick_tile(m_pad, k_total)
    n_in = len(wmats)
    kern = functools.partial(_final_conv_bias_tanh_kernel, n_in=n_in)
    in_specs = [pl.BlockSpec(w.shape, lambda i: (0, 0)) for w in wmats]
    in_specs += [pl.BlockSpec((3, 1), lambda i: (0, 0))]
    in_specs += [pl.BlockSpec((p.shape[0], tn), lambda i: (0, i)) for p in patch_parts]
    return pl.pallas_call(
        kern,
        out_shape=jax.ShapeDtypeStruct((3, m_pad), jnp.float32),
        grid=(nt,),
        in_specs=in_specs,
        out_specs=pl.BlockSpec((3, tn), lambda i: (0, i)),
        compiler_params=pltpu.CompilerParams(dimension_semantics=("parallel",)),
    )(*wmats, bias, *patch_parts)


# ----------------------------------------------------------------------------
# Conv lowering glue (channel-major im2col), deconv decomposition
# ----------------------------------------------------------------------------
def im2col(x_cnhw, k, stride, pads):
    """Channel-major im2col: (C, N, H, W) -> (C*k*k, N*Ho*Wo), K ordered (cin, kh, kw).
    TODO(synk): for large images fold the patch extraction into the kernel
    (k*k shifted matmuls from a halo'd VMEM slab); at 16x16 the patch matrix is
    <0.3 MiB, so per-call / per-step overheads dominate instead."""
    if k == 1 and stride == 1:
        c, n, h, w = x_cnhw.shape
        return x_cnhw.reshape(c, n * h * w), (n, h, w)
    pt, pb, pleft, pright = pads
    xp = jnp.pad(x_cnhw, ((0, 0), (0, 0), (pt, pb), (pleft, pright)))
    c, n, hp, wp = xp.shape
    ho = (hp - k) // stride + 1
    wo = (wp - k) // stride + 1
    cols = [xp[:, :, i:i + stride * ho:stride, j:j + stride * wo:stride]
            for i in range(k) for j in range(k)]
    patches = jnp.stack(cols, axis=1)                 # (C, k*k, N, Ho, Wo)
    return patches.reshape(c * k * k, n * ho * wo), (n, ho, wo)


def conv_bn_act_layer(parts, wmat, gamma, beta, *, k, stride, pads, act, parity):
    """One fused pallas_call: conv (split-K over `parts`, i.e. no skip concat)
    + train-mode BatchNorm + activation.  Returns the bf16 (C, M_pad) slab."""
    patch_parts, koffs = [], [0]
    spatial = None
    for part in parts:
        p_i, spatial = im2col(part, k, stride, pads)
        patch_parts.append(p_i)
        koffs.append(koffs[-1] + p_i.shape[0])
    assert wmat.shape[1] == koffs[-1]
    n, ho, wo = spatial
    m = n * ho * wo
    m_pad = pl.cdiv(m, 128) * 128
    if m_pad != m:
        patch_parts = [jnp.pad(p, ((0, 0), (0, m_pad - m))) for p in patch_parts]
    wmats = [wmat[:, koffs[t]:koffs[t + 1]] for t in range(len(parts))]
    y = fused_conv_bn_act(wmats, gamma, beta, patch_parts, m, act=act, parity=parity)
    return y, (n, ho, wo), m


def deconv_as_conv3x3_weight(w_iokk):
    """ConvTranspose2d(k=4, s=2, p=1) == 4 output parities, each a 2x2 stride-1
    conv on the pad-1 input.  Embed each parity's taps into a 3x3 kernel so all
    4 parities run as ONE matmul with 4*Cout parity-major output channels.
    Precomputed once at init time (perf feedback)."""
    cin, cout = w_iokk.shape[0], w_iokk.shape[1]
    w_embed = jnp.zeros((2, 2, cout, cin, 3, 3), w_iokk.dtype)
    for r in range(2):
        for c in range(2):
            for dh in range(2):
                for dw in range(2):
                    tap = jnp.transpose(
                        w_iokk[:, :, (3 - r) - 2 * dh, (3 - c) - 2 * dw], (1, 0))
                    w_embed = w_embed.at[r, c, :, :, r + dh, c + dw].set(tap)
    return w_embed.reshape(4 * cout, cin * 9)          # parity-major channels


# ----------------------------------------------------------------------------
# Generator parameters + forward
# ----------------------------------------------------------------------------
def init_generator_params(key, contracting_layers, expansive_layers):
    params = {"down": [], "up": [], "final": None}
    in_ch = 1
    for idx, (out_ch, _dropout) in enumerate(contracting_layers):
        key, k1, k2, k3 = jax.random.split(key, 4)
        w = 0.05 * jax.random.normal(k1, (out_ch, in_ch, 4, 4), jnp.float32)
        # Conv bias omitted: absorbed exactly by the train-mode BatchNorm mean.
        params["down"].append(dict(
            wmat=w.reshape(out_ch, in_ch * 16).astype(jnp.bfloat16),
            gamma=1.0 + 0.1 * jax.random.normal(k2, (out_ch, 1), jnp.float32),
            beta=0.1 * jax.random.normal(k3, (out_ch, 1), jnp.float32),
            stride=1 if idx == 0 else 2,
            same=(idx == 0),
        ))
        in_ch = out_ch
    for out_ch, _dropout in expansive_layers:
        key, k1, k2, k3 = jax.random.split(key, 4)
        w = 0.05 * jax.random.normal(k1, (in_ch, out_ch, 4, 4), jnp.float32)
        params["up"].append(dict(
            # Parity-embedded 3x3 weight, precomputed at init (perf feedback).
            wmat=deconv_as_conv3x3_weight(w).astype(jnp.bfloat16),
            gamma=1.0 + 0.1 * jax.random.normal(k2, (out_ch, 1), jnp.float32),
            beta=0.1 * jax.random.normal(k3, (out_ch, 1), jnp.float32),
        ))
        in_ch = out_ch * 2
    key, k1, k2 = jax.random.split(key, 3)
    params["final"] = dict(
        wmat=(0.05 * jax.random.normal(k1, (3, in_ch), jnp.float32)).astype(jnp.bfloat16),
        b=0.05 * jax.random.normal(k2, (3, 1), jnp.float32),
    )
    return params


def generator_forward(params, x_nchw):
    # NCHW in / NCHW out (matches PyTorch); channel-major (C, N, H, W) inside.
    assert len(params["up"]) == len(params["down"]) - 1
    x = jnp.transpose(x_nchw, (1, 0, 2, 3)).astype(jnp.bfloat16)
    parts = [x]
    skips = []
    for p in params["down"]:
        # PyTorch padding='same' for kernel 4 / stride 1: pad 1 low, 2 high.
        pads = (1, 2, 1, 2) if p["same"] else (1, 1, 1, 1)
        y, (n, ho, wo), m = conv_bn_act_layer(
            parts, p["wmat"], p["gamma"], p["beta"],
            k=4, stride=p["stride"], pads=pads, act="leaky_relu", parity=1)
        out = y[:, :m].reshape(-1, n, ho, wo)
        skips.append(out)
        parts = [out]
        # TODO(synk): nn.Dropout (train mode) not modeled; these configs use dropout=0.
    for idx, p in enumerate(params["up"]):
        y, (n, ho, wo), m = conv_bn_act_layer(
            parts, p["wmat"], p["gamma"], p["beta"],
            k=3, stride=1, pads=(1, 1, 1, 1), act="relu", parity=4)
        cout = p["gamma"].shape[0]
        a = y[:, :m].reshape(2, 2, cout, n, ho, wo)
        # interleave parities: out[co, nn, 2a+r, 2b+c] = a[r, c, co, nn, a, b]
        # TODO(synk): fold this interleave into the consumer's patch indexing so
        # the transpose never materializes (tensors are tiny at this scale).
        out = jnp.transpose(a, (2, 3, 4, 0, 5, 1)).reshape(cout, n, 2 * ho, 2 * wo)
        mirror = skips[len(skips) - idx - 2]
        parts = [out, mirror]            # skip concat avoided: split-K in kernel
    # final: 1x1 conv + bias + tanh, one fused call, split-K over the two parts
    pf = params["final"]
    n, h, w = parts[0].shape[1:]
    m = n * h * w
    m_pad = pl.cdiv(m, 128) * 128
    patch_parts, koffs = [], [0]
    for prt in parts:
        flat = prt.reshape(prt.shape[0], m)
        if m_pad != m:
            flat = jnp.pad(flat, ((0, 0), (0, m_pad - m)))
        patch_parts.append(flat)
        koffs.append(koffs[-1] + prt.shape[0])
    wmats = [pf["wmat"][:, koffs[t]:koffs[t + 1]] for t in range(len(parts))]
    y = final_conv_bias_tanh(wmats, pf["b"], patch_parts)
    y = y[:, :m].reshape(3, n, h, w)
    return jnp.transpose(y, (1, 0, 2, 3))


if __name__ == "__main__":
    key = jax.random.PRNGKey(0)
    contracting_layers = [(8, 0), (16, 0), (32, 0)]   # (out_channels, dropout)
    expansive_layers = [(16, 0), (8, 0)]

    kp, kx = jax.random.split(key)
    params = init_generator_params(kp, contracting_layers, expansive_layers)

    x = jax.random.normal(kx, (2, 1, 16, 16), jnp.float32)   # NCHW, 1 input channel

    fwd = jax.jit(lambda inp: generator_forward(params, inp))
    out = jax.block_until_ready(fwd(x))

    assert out.shape == (2, 3, 16, 16), out.shape
    assert bool(jnp.all(jnp.isfinite(out)))
    assert bool(jnp.all(jnp.abs(out) <= 1.0))  # tanh range
    print("KERNEL_OK")
</pallas_src>

<mosaic_0001>
module attributes {stable_mosaic.version = 11 : i64} {
  func.func @_fused_conv_bn_act_kernel(%arg0: i32, %arg1: memref<8x16xbf16, #tpu.memory_space<vmem>>, %arg2: memref<8x1xf32, #tpu.memory_space<vmem>>, %arg3: memref<8x1xf32, #tpu.memory_space<vmem>>, %arg4: memref<16x512xbf16, #tpu.memory_space<vmem>>, %arg5: memref<8x512xbf16, #tpu.memory_space<vmem>>) attributes {dimension_semantics = [#tpu.dimension_semantics<arbitrary>], iteration_bounds = array<i64: 1>, scalar_prefetch = 0 : i64, scratch_operands = 0 : i64, tpu.core_type = #tpu.core_type<tc>, window_params = [{pipeline_mode = #tpu.pipeline_mode<synchronous>, transform_indices = @transform_0, window_bounds = array<i64: 8, 16>}, {pipeline_mode = #tpu.pipeline_mode<synchronous>, transform_indices = @transform_1, window_bounds = array<i64: 8, 1>}, {pipeline_mode = #tpu.pipeline_mode<synchronous>, transform_indices = @transform_2, window_bounds = array<i64: 8, 1>}, {transform_indices = @transform_3, window_bounds = array<i64: 16, 512>}, {pipeline_mode = #tpu.pipeline_mode<synchronous>, transform_indices = @transform_4, window_bounds = array<i64: 8, 512>}]} {
    %c0 = arith.constant 0 : index
    %c0_0 = arith.constant 0 : index
    %0 = vector.load %arg1[%c0, %c0_0] : memref<8x16xbf16, #tpu.memory_space<vmem>>, vector<8x16xbf16>
    %c0_1 = arith.constant 0 : index
    %c0_2 = arith.constant 0 : index
    %1 = vector.load %arg4[%c0_1, %c0_2] : memref<16x512xbf16, #tpu.memory_space<vmem>>, vector<16x512xbf16>
    %cst = arith.constant dense<0.000000e+00> : vector<8x512xf32>
    %2 = tpu.matmul %0, %1, %cst {dimension_numbers = #tpu.dot_dimension_numbers<[1], [0], [0], [1], [0, 0, 1, 1], [], []>} : vector<8x16xbf16>, vector<16x512xbf16>, vector<8x512xf32> -> vector<8x512xf32>
    %cst_3 = arith.constant dense<0.000000e+00> : vector<8xf32>
    %3 = vector.multi_reduction <add>, %2, %cst_3 [1] : vector<8x512xf32> to vector<8xf32>
    %4 = vector.shape_cast %3 : vector<8xf32> to vector<8x1xf32>
    %5 = arith.mulf %2, %2 : vector<8x512xf32>
    %cst_4 = arith.constant dense<0.000000e+00> : vector<8xf32>
    %6 = vector.multi_reduction <add>, %5, %cst_4 [1] : vector<8x512xf32> to vector<8xf32>
    %7 = vector.shape_cast %6 : vector<8xf32> to vector<8x1xf32>
    %cst_5 = arith.constant 0.001953125 : f32
    %8 = vector.broadcast %cst_5 : f32 to vector<8x1xf32>
    %9 = arith.mulf %4, %8 : vector<8x1xf32>
    %cst_6 = arith.constant 0.001953125 : f32
    %10 = vector.broadcast %cst_6 : f32 to vector<8x1xf32>
    %11 = arith.mulf %7, %10 : vector<8x1xf32>
    %12 = arith.mulf %9, %9 : vector<8x1xf32>
    %13 = arith.subf %11, %12 : vector<8x1xf32>
    %cst_7 = arith.constant 0.000000e+00 : f32
    %14 = vector.broadcast %cst_7 : f32 to vector<8x1xf32>
    %15 = arith.maximumf %13, %14 : vector<8x1xf32>
    %c0_8 = arith.constant 0 : index
    %c0_9 = arith.constant 0 : index
    %16 = vector.load %arg2[%c0_8, %c0_9] : memref<8x1xf32, #tpu.memory_space<vmem>>, vector<8x1xf32>
    %cst_10 = arith.constant 9.99999974E-6 : f32
    %17 = vector.broadcast %cst_10 : f32 to vector<8x1xf32>
    %18 = arith.addf %15, %17 : vector<8x1xf32>
    %19 = math.rsqrt %18 : vector<8x1xf32>
    %20 = arith.mulf %16, %19 : vector<8x1xf32>
    %c0_11 = arith.constant 0 : index
    %c0_12 = arith.constant 0 : index
    %21 = vector.load %arg3[%c0_11, %c0_12] : memref<8x1xf32, #tpu.memory_space<vmem>>, vector<8x1xf32>
    %22 = arith.mulf %9, %20 : vector<8x1xf32>
    %23 = arith.subf %21, %22 : vector<8x1xf32>
    %24 = vector.broadcast %20 : vector<8x1xf32> to vector<8x512xf32>
    %25 = arith.mulf %2, %24 : vector<8x512xf32>
    %26 = vector.broadcast %23 : vector<8x1xf32> to vector<8x512xf32>
    %27 = arith.addf %25, %26 : vector<8x512xf32>
    %cst_13 = arith.constant 0.000000e+00 : f32
    %28 = vector.broadcast %cst_13 : f32 to vector<8x512xf32>
    %29 = arith.cmpf oge, %27, %28 : vector<8x512xf32>
    %cst_14 = arith.constant 2.000000e-01 : f32
    %30 = vector.broadcast %cst_14 : f32 to vector<8x512xf32>
    %31 = arith.mulf %30, %27 : vector<8x512xf32>
    %32 = arith.select %29, %27, %31 : vector<8x512xi1>, vector<8x512xf32>
    %33 = arith.truncf %32 : vector<8x512xf32> to vector<8x512xbf16>
    %c0_15 = arith.constant 0 : index
    %c0_16 = arith.constant 0 : index
    %34 = vector.load %arg5[%c0_15, %c0_16] : memref<8x512xbf16, #tpu.memory_space<vmem>>, vector<8x512xbf16>
    tpu.vector_store %arg5[%c0_15, %c0_16], %33 {strides = array<i32>} : memref<8x512xbf16, #tpu.memory_space<vmem>>, vector<8x512xbf16>,
    return
  }
  func.func @transform_0(%arg0: i32) -> (i32, i32) {
    %c0_i32 = arith.constant 0 : i32
    %c0_i32_0 = arith.constant 0 : i32
    %c0_i32_1 = arith.constant 0 : i32
    return %c0_i32, %c0_i32_0 : i32, i32
  }
  func.func @transform_1(%arg0: i32) -> (i32, i32) {
    %c0_i32 = arith.constant 0 : i32
    %c0_i32_0 = arith.constant 0 : i32
    %c0_i32_1 = arith.constant 0 : i32
    return %c0_i32, %c0_i32_0 : i32, i32
  }
  func.func @transform_2(%arg0: i32) -> (i32, i32) {
    %c0_i32 = arith.constant 0 : i32
    %c0_i32_0 = arith.constant 0 : i32
    %c0_i32_1 = arith.constant 0 : i32
    return %c0_i32, %c0_i32_0 : i32, i32
  }
  func.func @transform_3(%arg0: i32) -> (i32, i32) {
    %c0_i32 = arith.constant 0 : i32
    %c0_i32_0 = arith.constant 0 : i32
    return %c0_i32, %arg0 : i32, i32
  }
  func.func @transform_4(%arg0: i32) -> (i32, i32) {
    %c0_i32 = arith.constant 0 : i32
    %c0_i32_0 = arith.constant 0 : i32
    %c0_i32_1 = arith.constant 0 : i32
    return %c0_i32, %c0_i32_0 : i32, i32
  }
}

module attributes {stable_mosaic.version = 11 : i64} {
  func.func @_fused_conv_bn_act_kernel(%arg0: i32, %arg1: memref<16x128xbf16, #tpu.memory_space<vmem>>, %arg2: memref<16x1xf32, #tpu.memory_space<vmem>>, %arg3: memref<16x1xf32, #tpu.memory_space<vmem>>, %arg4: memref<128x128xbf16, #tpu.memory_space<vmem>>, %arg5: memref<16x128xbf16, #tpu.memory_space<vmem>>) attributes {dimension_semantics = [#tpu.dimension_semantics<arbitrary>], iteration_bounds = array<i64: 1>, scalar_prefetch = 0 : i64, scratch_operands = 0 : i64, tpu.core_type = #tpu.core_type<tc>, window_params = [{pipeline_mode = #tpu.pipeline_mode<synchronous>, transform_indices = @transform_0, window_bounds = array<i64: 16, 128>}, {pipeline_mode = #tpu.pipeline_mode<synchronous>, transform_indices = @transform_1, window_bounds = array<i64: 16, 1>}, {pipeline_mode = #tpu.pipeline_mode<synchronous>, transform_indices = @transform_2, window_bounds = array<i64: 16, 1>}, {transform_indices = @transform_3, window_bounds = array<i64: 128, 128>}, {pipeline_mode = #tpu.pipeline_mode<synchronous>, transform_indices = @transform_4, window_bounds = array<i64: 16, 128>}]} {
    %c0 = arith.constant 0 : index
    %c0_0 = arith.constant 0 : index
    %0 = vector.load %arg1[%c0, %c0_0] : memref<16x128xbf16, #tpu.memory_space<vmem>>, vector<16x128xbf16>
    %c0_1 = arith.constant 0 : index
    %c0_2 = arith.constant 0 : index
    %1 = vector.load %arg4[%c0_1, %c0_2] : memref<128x128xbf16, #tpu.memory_space<vmem>>, vector<128x128xbf16>
    %cst = arith.constant dense<0.000000e+00> : vector<16x128xf32>
    %2 = tpu.matmul %0, %1, %cst {dimension_numbers = #tpu.dot_dimension_numbers<[1], [0], [0], [1], [0, 0, 1, 1], [], []>} : vector<16x128xbf16>, vector<128x128xbf16>, vector<16x128xf32> -> vector<16x128xf32>
    %cst_3 = arith.constant dense<0.000000e+00> : vector<16xf32>
    %3 = vector.multi_reduction <add>, %2, %cst_3 [1] : vector<16x128xf32> to vector<16xf32>
    %4 = vector.shape_cast %3 : vector<16xf32> to vector<16x1xf32>
    %5 = arith.mulf %2, %2 : vector<16x128xf32>
    %cst_4 = arith.constant dense<0.000000e+00> : vector<16xf32>
    %6 = vector.multi_reduction <add>, %5, %cst_4 [1] : vector<16x128xf32> to vector<16xf32>
    %7 = vector.shape_cast %6 : vector<16xf32> to vector<16x1xf32>
    %cst_5 = arith.constant 7.812500e-03 : f32
    %8 = vector.broadcast %cst_5 : f32 to vector<16x1xf32>
    %9 = arith.mulf %4, %8 : vector<16x1xf32>
    %cst_6 = arith.constant 7.812500e-03 : f32
    %10 = vector.broadcast %cst_6 : f32 to vector<16x1xf32>
    %11 = arith.mulf %7, %10 : vector<16x1xf32>
    %12 = arith.mulf %9, %9 : vector<16x1xf32>
    %13 = arith.subf %11, %12 : vector<16x1xf32>
    %cst_7 = arith.constant 0.000000e+00 : f32
    %14 = vector.broadcast %cst_7 : f32 to vector<16x1xf32>
    %15 = arith.maximumf %13, %14 : vector<16x1xf32>
    %c0_8 = arith.constant 0 : index
    %c0_9 = arith.constant 0 : index
    %16 = vector.load %arg2[%c0_8, %c0_9] : memref<16x1xf32, #tpu.memory_space<vmem>>, vector<16x1xf32>
    %cst_10 = arith.constant 9.99999974E-6 : f32
    %17 = vector.broadcast %cst_10 : f32 to vector<16x1xf32>
    %18 = arith.addf %15, %17 : vector<16x1xf32>
    %19 = math.rsqrt %18 : vector<16x1xf32>
    %20 = arith.mulf %16, %19 : vector<16x1xf32>
    %c0_11 = arith.constant 0 : index
    %c0_12 = arith.constant 0 : index
    %21 = vector.load %arg3[%c0_11, %c0_12] : memref<16x1xf32, #tpu.memory_space<vmem>>, vector<16x1xf32>
    %22 = arith.mulf %9, %20 : vector<16x1xf32>
    %23 = arith.subf %21, %22 : vector<16x1xf32>
    %24 = vector.broadcast %20 : vector<16x1xf32> to vector<16x128xf32>
    %25 = arith.mulf %2, %24 : vector<16x128xf32>
    %26 = vector.broadcast %23 : vector<16x1xf32> to vector<16x128xf32>
    %27 = arith.addf %25, %26 : vector<16x128xf32>
    %cst_13 = arith.constant 0.000000e+00 : f32
    %28 = vector.broadcast %cst_13 : f32 to vector<16x128xf32>
    %29 = arith.cmpf oge, %27, %28 : vector<16x128xf32>
    %cst_14 = arith.constant 2.000000e-01 : f32
    %30 = vector.broadcast %cst_14 : f32 to vector<16x128xf32>
    %31 = arith.mulf %30, %27 : vector<16x128xf32>
    %32 = arith.select %29, %27, %31 : vector<16x128xi1>, vector<16x128xf32>
    %33 = arith.truncf %32 : vector<16x128xf32> to vector<16x128xbf16>
    %c0_15 = arith.constant 0 : index
    %c0_16 = arith.constant 0 : index
    %34 = vector.load %arg5[%c0_15, %c0_16] : memref<16x128xbf16, #tpu.memory_space<vmem>>, vector<16x128xbf16>
    tpu.vector_store %arg5[%c0_15, %c0_16], %33 {strides = array<i32>} : memref<16x128xbf16, #tpu.memory_space<vmem>>, vector<16x128xbf16>,
    return
  }
  func.func @transform_0(%arg0: i32) -> (i32, i32) {
    %c0_i32 = arith.constant 0 : i32
    %c0_i32_0 = arith.constant 0 : i32
    %c0_i32_1 = arith.constant 0 : i32
    return %c0_i32, %c0_i32_0 : i32, i32
  }
  func.func @transform_1(%arg0: i32) -> (i32, i32) {
    %c0_i32 = arith.constant 0 : i32
    %c0_i32_0 = arith.constant 0 : i32
    %c0_i32_1 = arith.constant 0 : i32
    return %c0_i32, %c0_i32_0 : i32, i32
  }
  func.func @transform_2(%arg0: i32) -> (i32, i32) {
    %c0_i32 = arith.constant 0 : i32
    %c0_i32_0 = arith.constant 0 : i32
    %c0_i32_1 = arith.constant 0 : i32
    return %c0_i32, %c0_i32_0 : i32, i32
  }
  func.func @transform_3(%arg0: i32) -> (i32, i32) {
    %c0_i32 = arith.constant 0 : i32
    %c0_i32_0 = arith.constant 0 : i32
    return %c0_i32, %arg0 : i32, i32
  }
  func.func @transform_4(%arg0: i32) -> (i32, i32) {
    %c0_i32 = arith.constant 0 : i32
    %c0_i32_0 = arith.constant 0 : i32
    %c0_i32_1 = arith.constant 0 : i32
    return %c0_i32, %c0_i32_0 : i32, i32
  }
}

module attributes {stable_mosaic.version = 11 : i64} {
  func.func @_fused_conv_bn_act_kernel(%arg0: i32, %arg1: memref<32x256xbf16, #tpu.memory_space<vmem>>, %arg2: memref<32x1xf32, #tpu.memory_space<vmem>>, %arg3: memref<32x1xf32, #tpu.memory_space<vmem>>, %arg4: memref<256x128xbf16, #tpu.memory_space<vmem>>, %arg5: memref<32x128xbf16, #tpu.memory_space<vmem>>) attributes {dimension_semantics = [#tpu.dimension_semantics<arbitrary>], iteration_bounds = array<i64: 1>, scalar_prefetch = 0 : i64, scratch_operands = 0 : i64, tpu.core_type = #tpu.core_type<tc>, window_params = [{pipeline_mode = #tpu.pipeline_mode<synchronous>, transform_indices = @transform_0, window_bounds = array<i64: 32, 256>}, {pipeline_mode = #tpu.pipeline_mode<synchronous>, transform_indices = @transform_1, window_bounds = array<i64: 32, 1>}, {pipeline_mode = #tpu.pipeline_mode<synchronous>, transform_indices = @transform_2, window_bounds = array<i64: 32, 1>}, {transform_indices = @transform_3, window_bounds = array<i64: 256, 128>}, {pipeline_mode = #tpu.pipeline_mode<synchronous>, transform_indices = @transform_4, window_bounds = array<i64: 32, 128>}]} {
    %c0 = arith.constant 0 : index
    %c0_0 = arith.constant 0 : index
    %0 = vector.load %arg1[%c0, %c0_0] : memref<32x256xbf16, #tpu.memory_space<vmem>>, vector<32x256xbf16>
    %c0_1 = arith.constant 0 : index
    %c0_2 = arith.constant 0 : index
    %1 = vector.load %arg4[%c0_1, %c0_2] : memref<256x128xbf16, #tpu.memory_space<vmem>>, vector<256x128xbf16>
    %cst = arith.constant dense<0.000000e+00> : vector<32x128xf32>
    %2 = tpu.matmul %0, %1, %cst {dimension_numbers = #tpu.dot_dimension_numbers<[1], [0], [0], [1], [0, 0, 1, 1], [], []>} : vector<32x256xbf16>, vector<256x128xbf16>, vector<32x128xf32> -> vector<32x128xf32>
    %cst_3 = arith.constant dense<0.000000e+00> : vector<32xf32>
    %3 = vector.multi_reduction <add>, %2, %cst_3 [1] : vector<32x128xf32> to vector<32xf32>
    %4 = vector.shape_cast %3 : vector<32xf32> to vector<32x1xf32>
    %5 = arith.mulf %2, %2 : vector<32x128xf32>
    %cst_4 = arith.constant dense<0.000000e+00> : vector<32xf32>
    %6 = vector.multi_reduction <add>, %5, %cst_4 [1] : vector<32x128xf32> to vector<32xf32>
    %7 = vector.shape_cast %6 : vector<32xf32> to vector<32x1xf32>
    %cst_5 = arith.constant 3.125000e-02 : f32
    %8 = vector.broadcast %cst_5 : f32 to vector<32x1xf32>
    %9 = arith.mulf %4, %8 : vector<32x1xf32>
    %cst_6 = arith.constant 3.125000e-02 : f32
    %10 = vector.broadcast %cst_6 : f32 to vector<32x1xf32>
    %11 = arith.mulf %7, %10 : vector<32x1xf32>
    %12 = arith.mulf %9, %9 : vector<32x1xf32>
    %13 = arith.subf %11, %12 : vector<32x1xf32>
    %cst_7 = arith.constant 0.000000e+00 : f32
    %14 = vector.broadcast %cst_7 : f32 to vector<32x1xf32>
    %15 = arith.maximumf %13, %14 : vector<32x1xf32>
    %c0_8 = arith.constant 0 : index
    %c0_9 = arith.constant 0 : index
    %16 = vector.load %arg2[%c0_8, %c0_9] : memref<32x1xf32, #tpu.memory_space<vmem>>, vector<32x1xf32>
    %cst_10 = arith.constant 9.99999974E-6 : f32
    %17 = vector.broadcast %cst_10 : f32 to vector<32x1xf32>
    %18 = arith.addf %15, %17 : vector<32x1xf32>
    %19 = math.rsqrt %18 : vector<32x1xf32>
    %20 = arith.mulf %16, %19 : vector<32x1xf32>
    %c0_11 = arith.constant 0 : index
    %c0_12 = arith.constant 0 : index
    %21 = vector.load %arg3[%c0_11, %c0_12] : memref<32x1xf32, #tpu.memory_space<vmem>>, vector<32x1xf32>
    %22 = arith.mulf %9, %20 : vector<32x1xf32>
    %23 = arith.subf %21, %22 : vector<32x1xf32>
    %24 = vector.broadcast %20 : vector<32x1xf32> to vector<32x128xf32>
    %25 = arith.mulf %2, %24 : vector<32x128xf32>
    %26 = vector.broadcast %23 : vector<32x1xf32> to vector<32x128xf32>
    %27 = arith.addf %25, %26 : vector<32x128xf32>
    %cst_13 = arith.constant 0.000000e+00 : f32
    %28 = vector.broadcast %cst_13 : f32 to vector<32x128xf32>
    %29 = arith.cmpf oge, %27, %28 : vector<32x128xf32>
    %cst_14 = arith.constant 2.000000e-01 : f32
    %30 = vector.broadcast %cst_14 : f32 to vector<32x128xf32>
    %31 = arith.mulf %30, %27 : vector<32x128xf32>
    %32 = arith.select %29, %27, %31 : vector<32x128xi1>, vector<32x128xf32>
    %33 = arith.truncf %32 : vector<32x128xf32> to vector<32x128xbf16>
    %c0_15 = arith.constant 0 : index
    %c0_16 = arith.constant 0 : index
    %34 = vector.load %arg5[%c0_15, %c0_16] : memref<32x128xbf16, #tpu.memory_space<vmem>>, vector<32x128xbf16>
    tpu.vector_store %arg5[%c0_15, %c0_16], %33 {strides = array<i32>} : memref<32x128xbf16, #tpu.memory_space<vmem>>, vector<32x128xbf16>,
    return
  }
  func.func @transform_0(%arg0: i32) -> (i32, i32) {
    %c0_i32 = arith.constant 0 : i32
    %c0_i32_0 = arith.constant 0 : i32
    %c0_i32_1 = arith.constant 0 : i32
    return %c0_i32, %c0_i32_0 : i32, i32
  }
  func.func @transform_1(%arg0: i32) -> (i32, i32) {
    %c0_i32 = arith.constant 0 : i32
    %c0_i32_0 = arith.constant 0 : i32
    %c0_i32_1 = arith.constant 0 : i32
    return %c0_i32, %c0_i32_0 : i32, i32
  }
  func.func @transform_2(%arg0: i32) -> (i32, i32) {
    %c0_i32 = arith.constant 0 : i32
    %c0_i32_0 = arith.constant 0 : i32
    %c0_i32_1 = arith.constant 0 : i32
    return %c0_i32, %c0_i32_0 : i32, i32
  }
  func.func @transform_3(%arg0: i32) -> (i32, i32) {
    %c0_i32 = arith.constant 0 : i32
    %c0_i32_0 = arith.constant 0 : i32
    return %c0_i32, %arg0 : i32, i32
  }
  func.func @transform_4(%arg0: i32) -> (i32, i32) {
    %c0_i32 = arith.constant 0 : i32
    %c0_i32_0 = arith.constant 0 : i32
    %c0_i32_1 = arith.constant 0 : i32
    return %c0_i32, %c0_i32_0 : i32, i32
  }
}

module attributes {stable_mosaic.version = 11 : i64} {
  func.func @_fused_conv_bn_act_kernel(%arg0: i32, %arg1: memref<64x288xbf16, #tpu.memory_space<vmem>>, %arg2: memref<16x1xf32, #tpu.memory_space<vmem>>, %arg3: memref<16x1xf32, #tpu.memory_space<vmem>>, %arg4: memref<288x128xbf16, #tpu.memory_space<vmem>>, %arg5: memref<64x128xbf16, #tpu.memory_space<vmem>>) attributes {dimension_semantics = [#tpu.dimension_semantics<arbitrary>], iteration_bounds = array<i64: 1>, scalar_prefetch = 0 : i64, scratch_operands = 0 : i64, tpu.core_type = #tpu.core_type<tc>, window_params = [{pipeline_mode = #tpu.pipeline_mode<synchronous>, transform_indices = @transform_0, window_bounds = array<i64: 64, 288>}, {pipeline_mode = #tpu.pipeline_mode<synchronous>, transform_indices = @transform_1, window_bounds = array<i64: 16, 1>}, {pipeline_mode = #tpu.pipeline_mode<synchronous>, transform_indices = @transform_2, window_bounds = array<i64: 16, 1>}, {transform_indices = @transform_3, window_bounds = array<i64: 288, 128>}, {pipeline_mode = #tpu.pipeline_mode<synchronous>, transform_indices = @transform_4, window_bounds = array<i64: 64, 128>}]} {
    %c0 = arith.constant 0 : index
    %c0_0 = arith.constant 0 : index
    %0 = vector.load %arg1[%c0, %c0_0] : memref<64x288xbf16, #tpu.memory_space<vmem>>, vector<64x288xbf16>
    %c0_1 = arith.constant 0 : index
    %c0_2 = arith.constant 0 : index
    %1 = vector.load %arg4[%c0_1, %c0_2] : memref<288x128xbf16, #tpu.memory_space<vmem>>, vector<288x128xbf16>
    %cst = arith.constant dense<0.000000e+00> : vector<64x128xf32>
    %2 = tpu.matmul %0, %1, %cst {dimension_numbers = #tpu.dot_dimension_numbers<[1], [0], [0], [1], [0, 0, 1, 1], [], []>} : vector<64x288xbf16>, vector<288x128xbf16>, vector<64x128xf32> -> vector<64x128xf32>
    %cst_3 = arith.constant dense<0.000000e+00> : vector<64xf32>
    %3 = vector.multi_reduction <add>, %2, %cst_3 [1] : vector<64x128xf32> to vector<64xf32>
    %4 = vector.shape_cast %3 : vector<64xf32> to vector<64x1xf32>
    %5 = arith.mulf %2, %2 : vector<64x128xf32>
    %cst_4 = arith.constant dense<0.000000e+00> : vector<64xf32>
    %6 = vector.multi_reduction <add>, %5, %cst_4 [1] : vector<64x128xf32> to vector<64xf32>
    %7 = vector.shape_cast %6 : vector<64xf32> to vector<64x1xf32>
    %8 = vector.extract_strided_slice %4 {offsets = [0, 0], sizes = [16, 1], strides = [1, 1]} : vector<64x1xf32> to vector<16x1xf32>
    %cst_5 = arith.constant 0.000000e+00 : f32
    %9 = vector.broadcast %cst_5 : f32 to vector<16x1xf32>
    %10 = arith.addf %9, %8 : vector<16x1xf32>
    %11 = vector.extract_strided_slice %4 {offsets = [16, 0], sizes = [16, 1], strides = [1, 1]} : vector<64x1xf32> to vector<16x1xf32>
    %12 = arith.addf %10, %11 : vector<16x1xf32>
    %13 = vector.extract_strided_slice %4 {offsets = [32, 0], sizes = [16, 1], strides = [1, 1]} : vector<64x1xf32> to vector<16x1xf32>
    %14 = arith.addf %12, %13 : vector<16x1xf32>
    %15 = vector.extract_strided_slice %4 {offsets = [48, 0], sizes = [16, 1], strides = [1, 1]} : vector<64x1xf32> to vector<16x1xf32>
    %16 = arith.addf %14, %15 : vector<16x1xf32>
    %17 = vector.extract_strided_slice %7 {offsets = [0, 0], sizes = [16, 1], strides = [1, 1]} : vector<64x1xf32> to vector<16x1xf32>
    %cst_6 = arith.constant 0.000000e+00 : f32
    %18 = vector.broadcast %cst_6 : f32 to vector<16x1xf32>
    %19 = arith.addf %18, %17 : vector<16x1xf32>
    %20 = vector.extract_strided_slice %7 {offsets = [16, 0], sizes = [16, 1], strides = [1, 1]} : vector<64x1xf32> to vector<16x1xf32>
    %21 = arith.addf %19, %20 : vector<16x1xf32>
    %22 = vector.extract_strided_slice %7 {offsets = [32, 0], sizes = [16, 1], strides = [1, 1]} : vector<64x1xf32> to vector<16x1xf32>
    %23 = arith.addf %21, %22 : vector<16x1xf32>
    %24 = vector.extract_strided_slice %7 {offsets = [48, 0], sizes = [16, 1], strides = [1, 1]} : vector<64x1xf32> to vector<16x1xf32>
    %25 = arith.addf %23, %24 : vector<16x1xf32>
    %cst_7 = arith.constant 7.812500e-03 : f32
    %26 = vector.broadcast %cst_7 : f32 to vector<16x1xf32>
    %27 = arith.mulf %16, %26 : vector<16x1xf32>
    %cst_8 = arith.constant 7.812500e-03 : f32
    %28 = vector.broadcast %cst_8 : f32 to vector<16x1xf32>
    %29 = arith.mulf %25, %28 : vector<16x1xf32>
    %30 = arith.mulf %27, %27 : vector<16x1xf32>
    %31 = arith.subf %29, %30 : vector<16x1xf32>
    %cst_9 = arith.constant 0.000000e+00 : f32
    %32 = vector.broadcast %cst_9 : f32 to vector<16x1xf32>
    %33 = arith.maximumf %31, %32 : vector<16x1xf32>
    %c0_10 = arith.constant 0 : index
    %c0_11 = arith.constant 0 : index
    %34 = vector.load %arg2[%c0_10, %c0_11] : memref<16x1xf32, #tpu.memory_space<vmem>>, vector<16x1xf32>
    %cst_12 = arith.constant 9.99999974E-6 : f32
    %35 = vector.broadcast %cst_12 : f32 to vector<16x1xf32>
    %36 = arith.addf %33, %35 : vector<16x1xf32>
    %37 = math.rsqrt %36 : vector<16x1xf32>
    %38 = arith.mulf %34, %37 : vector<16x1xf32>
    %c0_13 = arith.constant 0 : index
    %c0_14 = arith.constant 0 : index
    %39 = vector.load %arg3[%c0_13, %c0_14] : memref<16x1xf32, #tpu.memory_space<vmem>>, vector<16x1xf32>
    %40 = arith.mulf %27, %38 : vector<16x1xf32>
    %41 = arith.subf %39, %40 : vector<16x1xf32>
    %42 = vector.extract_strided_slice %2 {offsets = [0, 0], sizes = [16, 128], strides = [1, 1]} : vector<64x128xf32> to vector<16x128xf32>
    %43 = vector.broadcast %38 : vector<16x1xf32> to vector<16x128xf32>
    %44 = arith.mulf %42, %43 : vector<16x128xf32>
    %45 = vector.broadcast %41 : vector<16x1xf32> to vector<16x128xf32>
    %46 = arith.addf %44, %45 : vector<16x128xf32>
    %cst_15 = arith.constant 0.000000e+00 : f32
    %47 = vector.broadcast %cst_15 : f32 to vector<16x128xf32>
    %48 = arith.maximumf %46, %47 : vector<16x128xf32>
    %49 = arith.truncf %48 : vector<16x128xf32> to vector<16x128xbf16>
    %c0_16 = arith.constant 0 : index
    %c0_17 = arith.constant 0 : index
    %50 = vector.load %arg5[%c0_16, %c0_17] : memref<64x128xbf16, #tpu.memory_space<vmem>>, vector<16x128xbf16>
    tpu.vector_store %arg5[%c0_16, %c0_17], %49 {strides = array<i32>} : memref<64x128xbf16, #tpu.memory_space<vmem>>, vector<16x128xbf16>,
    %51 = vector.extract_strided_slice %2 {offsets = [16, 0], sizes = [16, 128], strides = [1, 1]} : vector<64x128xf32> to vector<16x128xf32>
    %52 = vector.broadcast %38 : vector<16x1xf32> to vector<16x128xf32>
    %53 = arith.mulf %51, %52 : vector<16x128xf32>
    %54 = vector.broadcast %41 : vector<16x1xf32> to vector<16x128xf32>
    %55 = arith.addf %53, %54 : vector<16x128xf32>
    %cst_18 = arith.constant 0.000000e+00 : f32
    %56 = vector.broadcast %cst_18 : f32 to vector<16x128xf32>
    %57 = arith.maximumf %55, %56 : vector<16x128xf32>
    %58 = arith.truncf %57 : vector<16x128xf32> to vector<16x128xbf16>
    %c16 = arith.constant 16 : index
    %c0_19 = arith.constant 0 : index
    %59 = vector.load %arg5[%c16, %c0_19] : memref<64x128xbf16, #tpu.memory_space<vmem>>, vector<16x128xbf16>
    tpu.vector_store %arg5[%c16, %c0_19], %58 {strides = array<i32>} : memref<64x128xbf16, #tpu.memory_space<vmem>>, vector<16x128xbf16>,
    %60 = vector.extract_strided_slice %2 {offsets = [32, 0], sizes = [16, 128], strides = [1, 1]} : vector<64x128xf32> to vector<16x128xf32>
    %61 = vector.broadcast %38 : vector<16x1xf32> to vector<16x128xf32>
    %62 = arith.mulf %60, %61 : vector<16x128xf32>
    %63 = vector.broadcast %41 : vector<16x1xf32> to vector<16x128xf32>
    %64 = arith.addf %62, %63 : vector<16x128xf32>
    %cst_20 = arith.constant 0.000000e+00 : f32
    %65 = vector.broadcast %cst_20 : f32 to vector<16x128xf32>
    %66 = arith.maximumf %64, %65 : vector<16x128xf32>
    %67 = arith.truncf %66 : vector<16x128xf32> to vector<16x128xbf16>
    %c32 = arith.constant 32 : index
    %c0_21 = arith.constant 0 : index
    %68 = vector.load %arg5[%c32, %c0_21] : memref<64x128xbf16, #tpu.memory_space<vmem>>, vector<16x128xbf16>
    tpu.vector_store %arg5[%c32, %c0_21], %67 {strides = array<i32>} : memref<64x128xbf16, #tpu.memory_space<vmem>>, vector<16x128xbf16>,
    %69 = vector.extract_strided_slice %2 {offsets = [48, 0], sizes = [16, 128], strides = [1, 1]} : vector<64x128xf32> to vector<16x128xf32>
    %70 = vector.broadcast %38 : vector<16x1xf32> to vector<16x128xf32>
    %71 = arith.mulf %69, %70 : vector<16x128xf32>
    %72 = vector.broadcast %41 : vector<16x1xf32> to vector<16x128xf32>
    %73 = arith.addf %71, %72 : vector<16x128xf32>
    %cst_22 = arith.constant 0.000000e+00 : f32
    %74 = vector.broadcast %cst_22 : f32 to vector<16x128xf32>
    %75 = arith.maximumf %73, %74 : vector<16x128xf32>
    %76 = arith.truncf %75 : vector<16x128xf32> to vector<16x128xbf16>
    %c48 = arith.constant 48 : index
    %c0_23 = arith.constant 0 : index
    %77 = vector.load %arg5[%c48, %c0_23] : memref<64x128xbf16, #tpu.memory_space<vmem>>, vector<16x128xbf16>
    tpu.vector_store %arg5[%c48, %c0_23], %76 {strides = array<i32>} : memref<64x128xbf16, #tpu.memory_space<vmem>>, vector<16x128xbf16>,
    return
  }
  func.func @transform_0(%arg0: i32) -> (i32, i32) {
    %c0_i32 = arith.constant 0 : i32
    %c0_i32_0 = arith.constant 0 : i32
    %c0_i32_1 = arith.constant 0 : i32
    return %c0_i32, %c0_i32_0 : i32, i32
  }
  func.func @transform_1(%arg0: i32) -> (i32, i32) {
    %c0_i32 = arith.constant 0 : i32
    %c0_i32_0 = arith.constant 0 : i32
    %c0_i32_1 = arith.constant 0 : i32
    return %c0_i32, %c0_i32_0 : i32, i32
  }
  func.func @transform_2(%arg0: i32) -> (i32, i32) {
    %c0_i32 = arith.constant 0 : i32
    %c0_i32_0 = arith.constant 0 : i32
    %c0_i32_1 = arith.constant 0 : i32
    return %c0_i32, %c0_i32_0 : i32, i32
  }
  func.func @transform_3(%arg0: i32) -> (i32, i32) {
    %c0_i32 = arith.constant 0 : i32
    %c0_i32_0 = arith.constant 0 : i32
    return %c0_i32, %arg0 : i32, i32
  }
  func.func @transform_4(%arg0: i32) -> (i32, i32) {
    %c0_i32 = arith.constant 0 : i32
    %c0_i32_0 = arith.constant 0 : i32
    %c0_i32_1 = arith.constant 0 : i32
    return %c0_i32, %c0_i32_0 : i32, i32
  }
}

module attributes {stable_mosaic.version = 11 : i64} {
  func.func @_fused_conv_bn_act_kernel(%arg0: i32, %arg1: memref<32x144xbf16, #tpu.memory_space<vmem>>, %arg2: memref<32x144xbf16, #tpu.memory_space<vmem>>, %arg3: memref<8x1xf32, #tpu.memory_space<vmem>>, %arg4: memref<8x1xf32, #tpu.memory_space<vmem>>, %arg5: memref<144x128xbf16, #tpu.memory_space<vmem>>, %arg6: memref<144x128xbf16, #tpu.memory_space<vmem>>, %arg7: memref<32x128xbf16, #tpu.memory_space<vmem>>) attributes {dimension_semantics = [#tpu.dimension_semantics<arbitrary>], iteration_bounds = array<i64: 1>, scalar_prefetch = 0 : i64, scratch_operands = 0 : i64, tpu.core_type = #tpu.core_type<tc>, window_params = [{pipeline_mode = #tpu.pipeline_mode<synchronous>, transform_indices = @transform_0, window_bounds = array<i64: 32, 144>}, {pipeline_mode = #tpu.pipeline_mode<synchronous>, transform_indices = @transform_1, window_bounds = array<i64: 32, 144>}, {pipeline_mode = #tpu.pipeline_mode<synchronous>, transform_indices = @transform_2, window_bounds = array<i64: 8, 1>}, {pipeline_mode = #tpu.pipeline_mode<synchronous>, transform_indices = @transform_3, window_bounds = array<i64: 8, 1>}, {transform_indices = @transform_4, window_bounds = array<i64: 144, 128>}, {transform_indices = @transform_5, window_bounds = array<i64: 144, 128>}, {pipeline_mode = #tpu.pipeline_mode<synchronous>, transform_indices = @transform_6, window_bounds = array<i64: 32, 128>}]} {
    %c0 = arith.constant 0 : index
    %c0_0 = arith.constant 0 : index
    %0 = vector.load %arg1[%c0, %c0_0] : memref<32x144xbf16, #tpu.memory_space<vmem>>, vector<32x144xbf16>
    %c0_1 = arith.constant 0 : index
    %c0_2 = arith.constant 0 : index
    %1 = vector.load %arg5[%c0_1, %c0_2] : memref<144x128xbf16, #tpu.memory_space<vmem>>, vector<144x128xbf16>
    %cst = arith.constant dense<0.000000e+00> : vector<32x128xf32>
    %2 = tpu.matmul %0, %1, %cst {dimension_numbers = #tpu.dot_dimension_numbers<[1], [0], [0], [1], [0, 0, 1, 1], [], []>} : vector<32x144xbf16>, vector<144x128xbf16>, vector<32x128xf32> -> vector<32x128xf32>
    %c0_3 = arith.constant 0 : index
    %c0_4 = arith.constant 0 : index
    %3 = vector.load %arg2[%c0_3, %c0_4] : memref<32x144xbf16, #tpu.memory_space<vmem>>, vector<32x144xbf16>
    %c0_5 = arith.constant 0 : index
    %c0_6 = arith.constant 0 : index
    %4 = vector.load %arg6[%c0_5, %c0_6] : memref<144x128xbf16, #tpu.memory_space<vmem>>, vector<144x128xbf16>
    %cst_7 = arith.constant dense<0.000000e+00> : vector<32x128xf32>
    %5 = tpu.matmul %3, %4, %cst_7 {dimension_numbers = #tpu.dot_dimension_numbers<[1], [0], [0], [1], [0, 0, 1, 1], [], []>} : vector<32x144xbf16>, vector<144x128xbf16>, vector<32x128xf32> -> vector<32x128xf32>
    %6 = arith.addf %2, %5 : vector<32x128xf32>
    %cst_8 = arith.constant dense<0.000000e+00> : vector<32xf32>
    %7 = vector.multi_reduction <add>, %6, %cst_8 [1] : vector<32x128xf32> to vector<32xf32>
    %8 = vector.shape_cast %7 : vector<32xf32> to vector<32x1xf32>
    %9 = arith.mulf %6, %6 : vector<32x128xf32>
    %cst_9 = arith.constant dense<0.000000e+00> : vector<32xf32>
    %10 = vector.multi_reduction <add>, %9, %cst_9 [1] : vector<32x128xf32> to vector<32xf32>
    %11 = vector.shape_cast %10 : vector<32xf32> to vector<32x1xf32>
    %12 = vector.extract_strided_slice %8 {offsets = [0, 0], sizes = [8, 1], strides = [1, 1]} : vector<32x1xf32> to vector<8x1xf32>
    %cst_10 = arith.constant 0.000000e+00 : f32
    %13 = vector.broadcast %cst_10 : f32 to vector<8x1xf32>
    %14 = arith.addf %13, %12 : vector<8x1xf32>
    %15 = vector.extract_strided_slice %8 {offsets = [8, 0], sizes = [8, 1], strides = [1, 1]} : vector<32x1xf32> to vector<8x1xf32>
    %16 = arith.addf %14, %15 : vector<8x1xf32>
    %17 = vector.extract_strided_slice %8 {offsets = [16, 0], sizes = [8, 1], strides = [1, 1]} : vector<32x1xf32> to vector<8x1xf32>
    %18 = arith.addf %16, %17 : vector<8x1xf32>
    %19 = vector.extract_strided_slice %8 {offsets = [24, 0], sizes = [8, 1], strides = [1, 1]} : vector<32x1xf32> to vector<8x1xf32>
    %20 = arith.addf %18, %19 : vector<8x1xf32>
    %21 = vector.extract_strided_slice %11 {offsets = [0, 0], sizes = [8, 1], strides = [1, 1]} : vector<32x1xf32> to vector<8x1xf32>
    %cst_11 = arith.constant 0.000000e+00 : f32
    %22 = vector.broadcast %cst_11 : f32 to vector<8x1xf32>
    %23 = arith.addf %22, %21 : vector<8x1xf32>
    %24 = vector.extract_strided_slice %11 {offsets = [8, 0], sizes = [8, 1], strides = [1, 1]} : vector<32x1xf32> to vector<8x1xf32>
    %25 = arith.addf %23, %24 : vector<8x1xf32>
    %26 = vector.extract_strided_slice %11 {offsets = [16, 0], sizes = [8, 1], strides = [1, 1]} : vector<32x1xf32> to vector<8x1xf32>
    %27 = arith.addf %25, %26 : vector<8x1xf32>
    %28 = vector.extract_strided_slice %11 {offsets = [24, 0], sizes = [8, 1], strides = [1, 1]} : vector<32x1xf32> to vector<8x1xf32>
    %29 = arith.addf %27, %28 : vector<8x1xf32>
    %cst_12 = arith.constant 0.001953125 : f32
    %30 = vector.broadcast %cst_12 : f32 to vector<8x1xf32>
    %31 = arith.mulf %20, %30 : vector<8x1xf32>
    %cst_13 = arith.constant 0.001953125 : f32
    %32 = vector.broadcast %cst_13 : f32 to vector<8x1xf32>
    %33 = arith.mulf %29, %32 : vector<8x1xf32>
    %34 = arith.mulf %31, %31 : vector<8x1xf32>
    %35 = arith.subf %33, %34 : vector<8x1xf32>
    %cst_14 = arith.constant 0.000000e+00 : f32
    %36 = vector.broadcast %cst_14 : f32 to vector<8x1xf32>
    %37 = arith.maximumf %35, %36 : vector<8x1xf32>
    %c0_15 = arith.constant 0 : index
    %c0_16 = arith.constant 0 : index
    %38 = vector.load %arg3[%c0_15, %c0_16] : memref<8x1xf32, #tpu.memory_space<vmem>>, vector<8x1xf32>
    %cst_17 = arith.constant 9.99999974E-6 : f32
    %39 = vector.broadcast %cst_17 : f32 to vector<8x1xf32>
    %40 = arith.addf %37, %39 : vector<8x1xf32>
    %41 = math.rsqrt %40 : vector<8x1xf32>
    %42 = arith.mulf %38, %41 : vector<8x1xf32>
    %c0_18 = arith.constant 0 : index
    %c0_19 = arith.constant 0 : index
    %43 = vector.load %arg4[%c0_18, %c0_19] : memref<8x1xf32, #tpu.memory_space<vmem>>, vector<8x1xf32>
    %44 = arith.mulf %31, %42 : vector<8x1xf32>
    %45 = arith.subf %43, %44 : vector<8x1xf32>
    %46 = vector.extract_strided_slice %6 {offsets = [0, 0], sizes = [8, 128], strides = [1, 1]} : vector<32x128xf32> to vector<8x128xf32>
    %47 = vector.broadcast %42 : vector<8x1xf32> to vector<8x128xf32>
    %48 = arith.mulf %46, %47 : vector<8x128xf32>
    %49 = vector.broadcast %45 : vector<8x1xf32> to vector<8x128xf32>
    %50 = arith.addf %48, %49 : vector<8x128xf32>
    %cst_20 = arith.constant 0.000000e+00 : f32
    %51 = vector.broadcast %cst_20 : f32 to vector<8x128xf32>
    %52 = arith.maximumf %50, %51 : vector<8x128xf32>
    %53 = arith.truncf %52 : vector<8x128xf32> to vector<8x128xbf16>
    %c0_21 = arith.constant 0 : index
    %c0_22 = arith.constant 0 : index
    %54 = vector.load %arg7[%c0_21, %c0_22] : memref<32x128xbf16, #tpu.memory_space<vmem>>, vector<8x128xbf16>
    tpu.vector_store %arg7[%c0_21, %c0_22], %53 {strides = array<i32>} : memref<32x128xbf16, #tpu.memory_space<vmem>>, vector<8x128xbf16>,
    %55 = vector.extract_strided_slice %6 {offsets = [8, 0], sizes = [8, 128], strides = [1, 1]} : vector<32x128xf32> to vector<8x128xf32>
    %56 = vector.broadcast %42 : vector<8x1xf32> to vector<8x128xf32>
    %57 = arith.mulf %55, %56 : vector<8x128xf32>
    %58 = vector.broadcast %45 : vector<8x1xf32> to vector<8x128xf32>
    %59 = arith.addf %57, %58 : vector<8x128xf32>
    %cst_23 = arith.constant 0.000000e+00 : f32
    %60 = vector.broadcast %cst_23 : f32 to vector<8x128xf32>
    %61 = arith.maximumf %59, %60 : vector<8x128xf32>
    %62 = arith.truncf %61 : vector<8x128xf32> to vector<8x128xbf16>
    %c8 = arith.constant 8 : index
    %c0_24 = arith.constant 0 : index
    %63 = vector.load %arg7[%c8, %c0_24] : memref<32x128xbf16, #tpu.memory_space<vmem>>, vector<8x128xbf16>
    tpu.vector_store %arg7[%c8, %c0_24], %62 {strides = array<i32>} : memref<32x128xbf16, #tpu.memory_space<vmem>>, vector<8x128xbf16>,
    %64 = vector.extract_strided_slice %6 {offsets = [16, 0], sizes = [8, 128], strides = [1, 1]} : vector<32x128xf32> to vector<8x128xf32>
    %65 = vector.broadcast %42 : vector<8x1xf32> to vector<8x128xf32>
    %66 = arith.mulf %64, %65 : vector<8x128xf32>
    %67 = vector.broadcast %45 : vector<8x1xf32> to vector<8x128xf32>
    %68 = arith.addf %66, %67 : vector<8x128xf32>
    %cst_25 = arith.constant 0.000000e+00 : f32
    %69 = vector.broadcast %cst_25 : f32 to vector<8x128xf32>
    %70 = arith.maximumf %68, %69 : vector<8x128xf32>
    %71 = arith.truncf %70 : vector<8x128xf32> to vector<8x128xbf16>
    %c16 = arith.constant 16 : index
    %c0_26 = arith.constant 0 : index
    %72 = vector.load %arg7[%c16, %c0_26] : memref<32x128xbf16, #tpu.memory_space<vmem>>, vector<8x128xbf16>
    tpu.vector_store %arg7[%c16, %c0_26], %71 {strides = array<i32>} : memref<32x128xbf16, #tpu.memory_space<vmem>>, vector<8x128xbf16>,
    %73 = vector.extract_strided_slice %6 {offsets = [24, 0], sizes = [8, 128], strides = [1, 1]} : vector<32x128xf32> to vector<8x128xf32>
    %74 = vector.broadcast %42 : vector<8x1xf32> to vector<8x128xf32>
    %75 = arith.mulf %73, %74 : vector<8x128xf32>
    %76 = vector.broadcast %45 : vector<8x1xf32> to vector<8x128xf32>
    %77 = arith.addf %75, %76 : vector<8x128xf32>
    %cst_27 = arith.constant 0.000000e+00 : f32
    %78 = vector.broadcast %cst_27 : f32 to vector<8x128xf32>
    %79 = arith.maximumf %77, %78 : vector<8x128xf32>
    %80 = arith.truncf %79 : vector<8x128xf32> to vector<8x128xbf16>
    %c24 = arith.constant 24 : index
    %c0_28 = arith.constant 0 : index
    %81 = vector.load %arg7[%c24, %c0_28] : memref<32x128xbf16, #tpu.memory_space<vmem>>, vector<8x128xbf16>
    tpu.vector_store %arg7[%c24, %c0_28], %80 {strides = array<i32>} : memref<32x128xbf16, #tpu.memory_space<vmem>>, vector<8x128xbf16>,
    return
  }
  func.func @transform_0(%arg0: i32) -> (i32, i32) {
    %c0_i32 = arith.constant 0 : i32
    %c0_i32_0 = arith.constant 0 : i32
    %c0_i32_1 = arith.constant 0 : i32
    return %c0_i32, %c0_i32_0 : i32, i32
  }
  func.func @transform_1(%arg0: i32) -> (i32, i32) {
    %c0_i32 = arith.constant 0 : i32
    %c0_i32_0 = arith.constant 0 : i32
    %c0_i32_1 = arith.constant 0 : i32
    return %c0_i32, %c0_i32_0 : i32, i32
  }
  func.func @transform_2(%arg0: i32) -> (i32, i32) {
    %c0_i32 = arith.constant 0 : i32
    %c0_i32_0 = arith.constant 0 : i32
    %c0_i32_1 = arith.constant 0 : i32
    return %c0_i32, %c0_i32_0 : i32, i32
  }
  func.func @transform_3(%arg0: i32) -> (i32, i32) {
    %c0_i32 = arith.constant 0 : i32
    %c0_i32_0 = arith.constant 0 : i32
    %c0_i32_1 = arith.constant 0 : i32
    return %c0_i32, %c0_i32_0 : i32, i32
  }
  func.func @transform_4(%arg0: i32) -> (i32, i32) {
    %c0_i32 = arith.constant 0 : i32
    %c0_i32_0 = arith.constant 0 : i32
    return %c0_i32, %arg0 : i32, i32
  }
  func.func @transform_5(%arg0: i32) -> (i32, i32) {
    %c0_i32 = arith.constant 0 : i32
    %c0_i32_0 = arith.constant 0 : i32
    return %c0_i32, %arg0 : i32, i32
  }
  func.func @transform_6(%arg0: i32) -> (i32, i32) {
    %c0_i32 = arith.constant 0 : i32
    %c0_i32_0 = arith.constant 0 : i32
    %c0_i32_1 = arith.constant 0 : i32
    return %c0_i32, %c0_i32_0 : i32, i32
  }
}

module attributes {stable_mosaic.version = 11 : i64} {
  func.func @_final_conv_bias_tanh_kernel(%arg0: i32, %arg1: memref<3x8xbf16, #tpu.memory_space<vmem>>, %arg2: memref<3x8xbf16, #tpu.memory_space<vmem>>, %arg3: memref<3x1xf32, #tpu.memory_space<vmem>>, %arg4: memref<8x512xbf16, #tpu.memory_space<vmem>>, %arg5: memref<8x512xbf16, #tpu.memory_space<vmem>>, %arg6: memref<3x512xf32, #tpu.memory_space<vmem>>) attributes {dimension_semantics = [#tpu.dimension_semantics<parallel>], iteration_bounds = array<i64: 1>, scalar_prefetch = 0 : i64, scratch_operands = 0 : i64, tpu.core_type = #tpu.core_type<tc>, window_params = [{pipeline_mode = #tpu.pipeline_mode<synchronous>, transform_indices = @transform_0, window_bounds = array<i64: 3, 8>}, {pipeline_mode = #tpu.pipeline_mode<synchronous>, transform_indices = @transform_1, window_bounds = array<i64: 3, 8>}, {pipeline_mode = #tpu.pipeline_mode<synchronous>, transform_indices = @transform_2, window_bounds = array<i64: 3, 1>}, {transform_indices = @transform_3, window_bounds = array<i64: 8, 512>}, {transform_indices = @transform_4, window_bounds = array<i64: 8, 512>}, {transform_indices = @transform_5, window_bounds = array<i64: 3, 512>}]} {
    %c0 = arith.constant 0 : index
    %c0_0 = arith.constant 0 : index
    %0 = vector.load %arg1[%c0, %c0_0] : memref<3x8xbf16, #tpu.memory_space<vmem>>, vector<3x8xbf16>
    %c0_1 = arith.constant 0 : index
    %c0_2 = arith.constant 0 : index
    %1 = vector.load %arg4[%c0_1, %c0_2] : memref<8x512xbf16, #tpu.memory_space<vmem>>, vector<8x512xbf16>
    %cst = arith.constant dense<0.000000e+00> : vector<3x512xf32>
    %2 = tpu.matmul %0, %1, %cst {dimension_numbers = #tpu.dot_dimension_numbers<[1], [0], [0], [1], [0, 0, 1, 1], [], []>} : vector<3x8xbf16>, vector<8x512xbf16>, vector<3x512xf32> -> vector<3x512xf32>
    %c0_3 = arith.constant 0 : index
    %c0_4 = arith.constant 0 : index
    %3 = vector.load %arg2[%c0_3, %c0_4] : memref<3x8xbf16, #tpu.memory_space<vmem>>, vector<3x8xbf16>
    %c0_5 = arith.constant 0 : index
    %c0_6 = arith.constant 0 : index
    %4 = vector.load %arg5[%c0_5, %c0_6] : memref<8x512xbf16, #tpu.memory_space<vmem>>, vector<8x512xbf16>
    %cst_7 = arith.constant dense<0.000000e+00> : vector<3x512xf32>
    %5 = tpu.matmul %3, %4, %cst_7 {dimension_numbers = #tpu.dot_dimension_numbers<[1], [0], [0], [1], [0, 0, 1, 1], [], []>} : vector<3x8xbf16>, vector<8x512xbf16>, vector<3x512xf32> -> vector<3x512xf32>
    %6 = arith.addf %2, %5 : vector<3x512xf32>
    %c0_8 = arith.constant 0 : index
    %c0_9 = arith.constant 0 : index
    %7 = vector.load %arg3[%c0_8, %c0_9] : memref<3x1xf32, #tpu.memory_space<vmem>>, vector<3x1xf32>
    %8 = vector.broadcast %7 : vector<3x1xf32> to vector<3x512xf32>
    %9 = arith.addf %6, %8 : vector<3x512xf32>
    %10 = math.tanh %9 : vector<3x512xf32>
    %c0_10 = arith.constant 0 : index
    %c0_11 = arith.constant 0 : index
    %11 = vector.load %arg6[%c0_10, %c0_11] : memref<3x512xf32, #tpu.memory_space<vmem>>, vector<3x512xf32>
    tpu.vector_store %arg6[%c0_10, %c0_11], %10 {strides = array<i32>} : memref<3x512xf32, #tpu.memory_space<vmem>>, vector<3x512xf32>,
    return
  }
  func.func @transform_0(%arg0: i32) -> (i32, i32) {
    %c0_i32 = arith.constant 0 : i32
    %c0_i32_0 = arith.constant 0 : i32
    %c0_i32_1 = arith.constant 0 : i32
    return %c0_i32, %c0_i32_0 : i32, i32
  }
  func.func @transform_1(%arg0: i32) -> (i32, i32) {
    %c0_i32 = arith.constant 0 : i32
    %c0_i32_0 = arith.constant 0 : i32
    %c0_i32_1 = arith.constant 0 : i32
    return %c0_i32, %c0_i32_0 : i32, i32
  }
  func.func @transform_2(%arg0: i32) -> (i32, i32) {
    %c0_i32 = arith.constant 0 : i32
    %c0_i32_0 = arith.constant 0 : i32
    %c0_i32_1 = arith.constant 0 : i32
    return %c0_i32, %c0_i32_0 : i32, i32
  }
  func.func @transform_3(%arg0: i32) -> (i32, i32) {
    %c0_i32 = arith.constant 0 : i32
    %c0_i32_0 = arith.constant 0 : i32
    return %c0_i32, %arg0 : i32, i32
  }
  func.func @transform_4(%arg0: i32) -> (i32, i32) {
    %c0_i32 = arith.constant 0 : i32
    %c0_i32_0 = arith.constant 0 : i32
    return %c0_i32, %arg0 : i32, i32
  }
  func.func @transform_5(%arg0: i32) -> (i32, i32) {
    %c0_i32 = arith.constant 0 : i32
    %c0_i32_0 = arith.constant 0 : i32
    return %c0_i32, %arg0 : i32, i32
  }
}

</mosaic_0001>

<bundles_post_ra>
// kernel: _lambda_.6
= control target key start
LH: loop header
LB: loop body
LE: loop exit
PB: predicated region body
PF: predicated region fallthrough
CT: control target
= control target key end

     0   :  { %v228_v1 = vmov 0   ;;  %vm43_vm0 = vcmask 130048   ;;  %s281_s3 = inlined_call_operand.vmem [shape: bf16[16,512], index: 3, kind: input, shape index: {}]   ;;  %s282_s0 = inlined_call_operand.vmem [shape: bf16[8,16], index: 0, kind: input, shape index: {}]   ;;  %s283_s1 = inlined_call_operand.vmem [shape: f32[8,1], index: 1, kind: input, shape index: {}]   ;;  %s284_s2 = inlined_call_operand.vmem [shape: f32[8,1], index: 2, kind: input, shape index: {}]   ;;  %s285_s4 = inlined_call_operand.vmem [shape: bf16[8,512], index: 4, kind: output, shape index: {}]  }
   0x1   :  { %v220_v0 = vld [vmem:[%s281_s3 + $0x4] ss:$16 sps:$4 sm:$0xff]   ;;  %79 = vmatprep.mubr.bf16.mxu0 %v228_v1  ;;  %120 = vmatprep.mubr.bf16.mxu1 %v228_v1  ;;  %v222_v2 = vld [vmem:[%s281_s3 + $0xc] ss:$16 sps:$4 sm:$0xff]   ;;  %v224_v3 = vld [vmem:[%s281_s3] ss:$16 sps:$4 sm:$0xff]  }
   0x2   :  { %218 = vset.pattern.permute.xlu1 %v228_v1  ;;  %219 = vset.pattern.permute.xlu0 %v228_v1  ;;  %v225_v4 = vld [vmem:[%s281_s3 + $0x8] ss:$16 sps:$4 sm:$0xff]   ;;  %v18_v5 = vld [vmem:[%s282_s0] sm:$0xf] }
   0x3   :  { %47 = vmatprep.subr.bf16.mxu0 %v220_v0  ;;  %88 = vmatprep.subr.bf16.mxu1 %v222_v2  ;;  %v148_v32 = vld [vmem:[%s283_s1] sm:$0xff] }
   0x4   :  { %48 = vmatpush1.bf16.msra.mxu0 %v224_v3  ;;  %89 = vmatpush1.bf16.msra.mxu1 %v225_v4  ;;  %v152_v35 = vld [vmem:[%s284_s2] sm:$0xff] }
   0x7   :  { %211 = vmatmul.mubr.msk.bf16.vlgmr.msra.gmra.mrb[0].mxu0 %vm43_vm0, %v18_v5  ;;  %212 = vmatmul.mubr.msk.bf16.vlgmr.msra.gmra.mrb[0].mxu1 %vm43_vm0, %v18_v5 }
  0xda   :  { %v81_v6 = vpop.f32.mrb[0].mxu0  ;;  %v122_v7 = vpop.f32.mrb[0].mxu1 }
  0xdb   :  { %v134_v8 = vmul.f32 %v81_v6, %v81_v6  ;;  %v83_v9 = vpop.f32.mrb[1].mxu0  ;;  %v124_v10 = vpop.f32.mrb[1].mxu1  ;;  %v136_v11 = vmul.f32 %v122_v7, %v122_v7 }
  0xdc   :  { %v129_v12 = vadd.f32 %v83_v9, %v81_v6  ;;  %v135_v13 = vmul.f32 %v83_v9, %v83_v9  ;;  %v85_v14 = vpop.f32.mrb[2].mxu0  ;;  %v126_v15 = vpop.f32.mrb[2].mxu1  ;;  %v137_v21 = vmul.f32 %v124_v10, %v124_v10 }
  0xdd   :  { %v86_v16 = vpop.f32.mrb[3].mxu0  ;;  %v127_v17 = vpop.f32.mrb[3].mxu1 }
  0xde   :  { %v130_v18 = vadd.f32 %v129_v12, %v122_v7  ;;  %v138_v19 = vadd.f32 %v135_v13, %v134_v8 }
  0xe0   :  { %v131_v20 = vadd.f32 %v130_v18, %v124_v10  ;;  %v139_v22 = vadd.f32 %v138_v19, %v136_v11 }
  0xe2   :  { %132 = vadd.xlane.f32.xlu0 %v131_v20  ;;  %v140_v23 = vadd.f32 %v139_v22, %v137_v21 }
  0xe6   :  { %141 = vadd.xlane.f32.xlu0 %v140_v23 }
 0x16f   :  { %v133_v24 = vpop.xlane.xlu0 %132 }
 0x170   :  { %v143_v25 = vmul.f32 0.001953125, %v133_v24 }
 0x172   :  { %v145_v27 = vmul.f32 %v143_v25, %v143_v25 }
 0x173   :  { %v142_v26 = vpop.xlane.xlu0 %141 }
 0x174   :  { %v144_v28 = vmul.f32 0.001953125, %v142_v26 }
 0x176   :  { %v146_v29 = vsub.f32 %v144_v28, %v145_v27 }
 0x178   :  { %v147_v30 = vmax.f32 %v146_v29, 0.0 }
 0x17a   :  { %v149_v31 = vadd.f32 1e-05, %v147_v30 }
 0x17c   :  { %226 = vrsqrt.f32 %v149_v31 }
 0x186   :  { %v227_v33 = vpop.eup %226 }
 0x187   :  { %v151_v34 = vmul.f32 %v227_v33, %v148_v32 }
 0x189   :  { %157 = vperm.xlu1 %218, %v151_v34   ;;  %v153_v36 = vmul.f32 %v151_v34, %v143_v25 }
 0x18b   :  { %v154_v37 = vsub.f32 %v152_v35, %v153_v36 }
 0x18d   :  { %166 = vperm.xlu1 %218, %v154_v37  }
 0x208   :  { %v158_v38 = vpop.permute.xlu1 %157 }
 0x209   :  { %v160_v39 = vmul.f32 %v158_v38, %v81_v6  ;;  %v161_v40 = vmul.f32 %v158_v38, %v83_v9  ;;  %v162_v41 = vmul.f32 %v158_v38, %v122_v7  ;;  %v163_v42 = vmul.f32 %v158_v38, %v124_v10 }
 0x20c   :  { %v167_v43 = vpop.permute.xlu1 %166 }
 0x20d   :  { %v169_v44 = vadd.f32 %v167_v43, %v160_v39  ;;  %v170_v45 = vadd.f32 %v167_v43, %v161_v40  ;;  %v171_v46 = vadd.f32 %v167_v43, %v162_v41  ;;  %v172_v47 = vadd.f32 %v167_v43, %v163_v42 }
 0x20f   :  { %vm173_vm1 = vcmp.ge.f32.partialorder %v169_v44, 0.0  ;;  %vm174_vm2 = vcmp.ge.f32.partialorder %v170_v45, 0.0  ;;  %vm175_vm3 = vcmp.ge.f32.partialorder %v171_v46, 0.0  ;;  %vm176_vm4 = vcmp.ge.f32.partialorder %v172_v47, 0.0 }
 0x210   :  { %v177_v48 = vmul.f32 0.2, %v169_v44  ;;  %v178_v49 = vmul.f32 0.2, %v170_v45  ;;  %v179_v50 = vmul.f32 0.2, %v171_v46 }
 0x211   :  { %v180_v51 = vmul.f32 0.2, %v172_v47 }
 0x212   :  { %v181_v52 = vsel %vm173_vm1, %v169_v44, %v177_v48  ;;  %v182_v53 = vsel %vm174_vm2, %v170_v45, %v178_v49  ;;  %v183_v54 = vsel %vm175_vm3, %v171_v46, %v179_v50 }
 0x213   :  { %v184_v55 = vsel %vm176_vm4, %v172_v47, %v180_v51  ;;  %v215_v56 = vpack.c.bf16 %v182_v53, %v181_v52 }
 0x214   :  { %v216_v57 = vpack.c.bf16 %v184_v55, %v183_v54 }
 0x215   :  { %201 = vst [vmem:[%s285_s4] sm:$0xff] %v215_v56 }
 0x216   :  { %202 = vst [vmem:[%s285_s4 + $0x8] sm:$0xff] %v216_v57 }

// kernel: _lambda_.7
= control target key start
LH: loop header
LB: loop body
LE: loop exit
PB: predicated region body
PF: predicated region fallthrough
CT: control target
= control target key end

     0   :  { %v274_v0 = vmov 0.0   ;;  %vm275_vm0 = vmmov 0   ;;  %v276_v16 = vmov 0   ;;  %s344_s3 = inlined_call_operand.vmem [shape: bf16[128,128], index: 3, kind: input, shape index: {}]   ;;  %s345_s0 = inlined_call_operand.vmem [shape: bf16[16,128], index: 0, kind: input, shape index: {}]   ;;  %s346_s1 = inlined_call_operand.vmem [shape: f32[16,1], index: 1, kind: input, shape index: {}]   ;;  %s347_s2 = inlined_call_operand.vmem [shape: f32[16,1], index: 2, kind: input, shape index: {}]   ;;  %s348_s4 = inlined_call_operand.vmem [shape: bf16[16,128], index: 4, kind: output, shape index: {}]  }
   0x1   :  { %236 = vmatprep.subr.bf16.mxu0 %v274_v0  ;;  %v261_v1 = vld [vmem:[%s344_s3] sm:$0xff]   ;;  %252 = vmatprep.mubr.msk.bf16.mxu0 %vm275_vm0, %v274_v0  ;;  %v262_v2 = vld [vmem:[%s344_s3 + $0x8] sm:$0xff]   ;;  %v263_v3 = vld [vmem:[%s344_s3 + $0x10] sm:$0xff]  }
   0x2   :  { %237 = vmatpush3.bf16.msra.mxu0 %v261_v1  ;;  %v264_v4 = vld [vmem:[%s344_s3 + $0x18] sm:$0xff]   ;;  %v265_v5 = vld [vmem:[%s344_s3 + $0x20] sm:$0xff]   ;;  %v266_v6 = vld [vmem:[%s344_s3 + $0x28] sm:$0xff]   ;;  %259 = vset.pattern.permute.xlu0 %v276_v16 }
   0x3   :  { %238 = vmatprep.subr.bf16.mxu0 %v274_v0  ;;  %v267_v7 = vld [vmem:[%s344_s3 + $0x30] sm:$0xff]   ;;  %v268_v8 = vld [vmem:[%s344_s3 + $0x38] sm:$0xff]   ;;  %v269_v9 = vld [vmem:[%s345_s0] sm:$0xff]   ;;  %260 = vset.pattern.permute.xlu1 %v276_v16 }
   0x4   :  { %v151_v33 = vld [vmem:[%s346_s1] sm:$0xff]  ;;  %v152_v36 = vld [vmem:[%s346_s1 + $0x8] sm:$0xff] }
   0x5   :  { %v159_v40 = vld [vmem:[%s347_s2] sm:$0xff]  ;;  %v160_v43 = vld [vmem:[%s347_s2 + $0x8] sm:$0xff] }
   0x6   :  { %239 = vmatpush3.bf16.msra.mxu0 %v262_v2 }
   0x7   :  { %240 = vmatprep.subr.bf16.mxu0 %v274_v0 }
   0xa   :  { %241 = vmatpush3.bf16.msra.mxu0 %v263_v3 }
   0xb   :  { %242 = vmatprep.subr.bf16.mxu0 %v274_v0 }
   0xe   :  { %243 = vmatpush3.bf16.msra.mxu0 %v264_v4 }
   0xf   :  { %244 = vmatprep.subr.bf16.mxu0 %v274_v0 }
  0x12   :  { %245 = vmatpush3.bf16.msra.mxu0 %v265_v5 }
  0x13   :  { %246 = vmatprep.subr.bf16.mxu0 %v274_v0 }
  0x16   :  { %247 = vmatpush3.bf16.msra.mxu0 %v266_v6 }
  0x17   :  { %248 = vmatprep.subr.bf16.mxu0 %v274_v0 }
  0x1a   :  { %249 = vmatpush3.bf16.msra.mxu0 %v267_v7 }
  0x1b   :  { %250 = vmatprep.subr.bf16.mxu0 %v274_v0 }
  0x1e   :  { %251 = vmatpush3.bf16.msra.mxu0 %v268_v8 }
  0x21   :  { %253 = vmatmul.mubr.bf16.vlgmr.msra.gmra.mrb[0].mxu0 %v269_v9 }
  0xf4   :  { %v124_v10 = vpop.f32.mrb[0].mxu0 }
  0xf5   :  { %131 = vadd.xlane.f32.xlu0 %v124_v10  ;;  %v254_v11 = vpop.f32.mrb[1].mxu0  ;;  %v135_v12 = vmul.f32 %v124_v10, %v124_v10 }
  0xf6   :  { %v127_v13 = vpop.f32.mrb[2].mxu0 }
  0xf7   :  { %137 = vadd.xlane.f32.xlu1 %v135_v12  ;;  %v255_v14 = vpop.f32.mrb[3].mxu0  ;;  %v136_v15 = vmul.f32 %v127_v13, %v127_v13 }
  0xf9   :  { %133 = vadd.xlane.f32.xlu0 %v127_v13 }
  0xfb   :  { %139 = vadd.xlane.f32.xlu1 %v136_v15 }
 0x182   :  { %v132_v17 = vpop.xlane.xlu0 %131 }
 0x183   :  { %v141_v18 = vmul.f32 0.0078125, %v132_v17 }
 0x184   :  { %v138_v19 = vpop.xlane.xlu1 %137 }
 0x185   :  { %v145_v20 = vmul.f32 %v141_v18, %v141_v18  ;;  %v143_v21 = vmul.f32 0.0078125, %v138_v19 }
 0x186   :  { %v134_v22 = vpop.xlane.xlu0 %133 }
 0x187   :  { %v147_v23 = vsub.f32 %v143_v21, %v145_v20  ;;  %v142_v24 = vmul.f32 0.0078125, %v134_v22 }
 0x188   :  { %v140_v25 = vpop.xlane.xlu1 %139 }
 0x189   :  { %v149_v26 = vmax.f32 %v147_v23, 0.0  ;;  %v146_v27 = vmul.f32 %v142_v24, %v142_v24  ;;  %v144_v28 = vmul.f32 0.0078125, %v140_v25 }
 0x18b   :  { %v153_v29 = vadd.f32 1e-05, %v149_v26  ;;  %v148_v30 = vsub.f32 %v144_v28, %v146_v27 }
 0x18d   :  { %270 = vrsqrt.f32 %v153_v29  ;;  %v150_v31 = vmax.f32 %v148_v30, 0.0 }
 0x18f   :  { %v154_v32 = vadd.f32 1e-05, %v150_v31 }
 0x191   :  { %272 = vrsqrt.f32 %v154_v32 }
 0x197   :  { %v271_v34 = vpop.eup %270 }
 0x198   :  { %v157_v35 = vmul.f32 %v271_v34, %v151_v33 }
 0x19a   :  { %167 = vperm.xlu0 %259, %v157_v35   ;;  %v161_v39 = vmul.f32 %v157_v35, %v141_v18 }
 0x19b   :  { %v273_v37 = vpop.eup %272 }
 0x19c   :  { %v158_v38 = vmul.f32 %v273_v37, %v152_v36  ;;  %v163_v41 = vsub.f32 %v159_v40, %v161_v39 }
 0x19e   :  { %172 = vperm.xlu1 %260, %v158_v38   ;;  %v162_v42 = vmul.f32 %v158_v38, %v142_v24 }
 0x1a0   :  { %v164_v44 = vsub.f32 %v160_v43, %v162_v42 }
 0x1a2   :  { %179 = vperm.xlu1 %260, %v163_v41  }
 0x1a6   :  { %184 = vperm.xlu1 %260, %v164_v44  }
 0x219   :  { %v168_v45 = vpop.permute.xlu0 %167 }
 0x21a   :  { %v175_v47 = vmul.f32 %v168_v45, %v124_v10 }
 0x21d   :  { %v173_v46 = vpop.permute.xlu1 %172 }
 0x21e   :  { %v176_v50 = vmul.f32 %v173_v46, %v127_v13 }
 0x221   :  { %v180_v48 = vpop.permute.xlu1 %179 }
 0x222   :  { %v187_v49 = vadd.f32 %v180_v48, %v175_v47 }
 0x224   :  { %v191_v52 = vmul.f32 0.2, %v187_v49  ;;  %vm189_vm1 = vcmp.ge.f32.partialorder %v187_v49, 0.0 }
 0x225   :  { %v185_v51 = vpop.permute.xlu1 %184 }
 0x226   :  { %v188_v53 = vadd.f32 %v185_v51, %v176_v50  ;;  %v193_v55 = vsel %vm189_vm1, %v187_v49, %v191_v52 }
 0x228   :  { %vm190_vm2 = vcmp.ge.f32.partialorder %v188_v53, 0.0  ;;  %v192_v54 = vmul.f32 0.2, %v188_v53 }
 0x22a   :  { %v194_v56 = vsel %vm190_vm2, %v188_v53, %v192_v54 }
 0x22b   :  { %v225_v57 = vpack.c.bf16 %v194_v56, %v193_v55 }
 0x22d   :  { %226 = vst [vmem:[%s348_s4] sm:$0xff] %v225_v57  }

// kernel: _lambda_.8
= control target key start
LH: loop header
LB: loop body
LE: loop exit
PB: predicated region body
PF: predicated region fallthrough
CT: control target
= control target key end

     0   :  { %v487_v36 = vmov 0   ;;  %s627_s3 = inlined_call_operand.vmem [shape: bf16[256,128], index: 3, kind: input, shape index: {}]   ;;  %s628_s0 = inlined_call_operand.vmem [shape: bf16[32,256], index: 0, kind: input, shape index: {}]   ;;  %s629_s1 = inlined_call_operand.vmem [shape: f32[32,1], index: 1, kind: input, shape index: {}]   ;;  %s630_s2 = inlined_call_operand.vmem [shape: f32[32,1], index: 2, kind: input, shape index: {}]   ;;  %s631_s4 = inlined_call_operand.vmem [shape: bf16[32,128], index: 4, kind: output, shape index: {}]  }
   0x1   :  { %v457_v0 = vld [vmem:[%s627_s3 + $0x40] sm:$0xff]   ;;  %v459_v2 = vld [vmem:[%s627_s3 + $0x48] sm:$0xff]   ;;  %v461_v4 = vld [vmem:[%s627_s3 + $0x50] sm:$0xff]   ;;  %455 = vset.pattern.permute.xlu0 %v487_v36  ;;  %456 = vset.pattern.permute.xlu1 %v487_v36 }
   0x2   :  { %v458_v1 = vld [vmem:[%s627_s3] sm:$0xff]   ;;  %410 = vmatprep.subr.bf16.mxu0 %v457_v0  ;;  %438 = vmatprep.subr.bf16.mxu1 %v457_v0  ;;  %v460_v3 = vld [vmem:[%s627_s3 + $0x8] sm:$0xff]   ;;  %v462_v5 = vld [vmem:[%s627_s3 + $0x10] sm:$0xff]  }
   0x3   :  { %411 = vmatpush3.bf16.msra.mxu0 %v458_v1  ;;  %446 = vmatpush3.bf16.msra.mxu1 %v458_v1  ;;  %v463_v6 = vld [vmem:[%s627_s3 + $0x58] sm:$0xff]   ;;  %v465_v8 = vld [vmem:[%s627_s3 + $0x60] sm:$0xff]   ;;  %v467_v10 = vld [vmem:[%s627_s3 + $0x68] sm:$0xff]  }
   0x4   :  { %412 = vmatprep.subr.bf16.mxu0 %v459_v2  ;;  %439 = vmatprep.subr.bf16.mxu1 %v459_v2  ;;  %v464_v7 = vld [vmem:[%s627_s3 + $0x18] sm:$0xff]   ;;  %v466_v9 = vld [vmem:[%s627_s3 + $0x20] sm:$0xff]   ;;  %v468_v13 = vld [vmem:[%s627_s3 + $0x28] sm:$0xff]  }
   0x5   :  { %v475_v11 = vld [vmem:[%s628_s0 + $0x4] ss:$8 sps:$4 sm:$0xff]   ;;  %v478_v12 = vld [vmem:[%s628_s0 + $0x14] ss:$8 sps:$4 sm:$0xff]   ;;  %v473_v18 = vld [vmem:[%s628_s0] ss:$8 sps:$4 sm:$0xff]  }
   0x6   :  { %v469_v14 = vld [vmem:[%s627_s3 + $0x70] sm:$0xff]   ;;  %202 = vmatprep.mubr.bf16.mxu0 %v475_v11  ;;  %210 = vmatprep.mubr.bf16.mxu1 %v478_v12  ;;  %v471_v16 = vld [vmem:[%s627_s3 + $0x78] sm:$0xff]   ;;  %v260_v12 = vld [vmem:[%s629_s1 + $0x8] sm:$0xff] }
   0x7   :  { %413 = vmatpush3.bf16.msra.mxu0 %v460_v3  ;;  %447 = vmatpush3.bf16.msra.mxu1 %v460_v3  ;;  %v470_v15 = vld [vmem:[%s627_s3 + $0x30] sm:$0xff]   ;;  %v472_v17 = vld [vmem:[%s627_s3 + $0x38] sm:$0xff]  }
   0x8   :  { %414 = vmatprep.subr.bf16.mxu0 %v461_v4  ;;  %440 = vmatprep.subr.bf16.mxu1 %v461_v4  ;;  %v476_v19 = vld [vmem:[%s628_s0 + $0x10] ss:$8 sps:$4 sm:$0xff]  }
   0xb   :  { %415 = vmatpush3.bf16.msra.mxu0 %v462_v5  ;;  %448 = vmatpush3.bf16.msra.mxu1 %v462_v5  ;;  %v259_v5 = vld [vmem:[%s629_s1] sm:$0xff] }
   0xc   :  { %416 = vmatprep.subr.bf16.mxu0 %v463_v6  ;;  %441 = vmatprep.subr.bf16.mxu1 %v463_v6 }
   0xf   :  { %417 = vmatpush3.bf16.msra.mxu0 %v464_v7  ;;  %449 = vmatpush3.bf16.msra.mxu1 %v464_v7 }
  0x10   :  { %418 = vmatprep.subr.bf16.mxu0 %v465_v8  ;;  %442 = vmatprep.subr.bf16.mxu1 %v465_v8  ;;  %v261_v8 = vld [vmem:[%s629_s1 + $0x10] sm:$0xff] }
  0x13   :  { %419 = vmatpush3.bf16.msra.mxu0 %v466_v9  ;;  %450 = vmatpush3.bf16.msra.mxu1 %v466_v9 }
  0x14   :  { %420 = vmatprep.subr.bf16.mxu0 %v467_v10  ;;  %443 = vmatprep.subr.bf16.mxu1 %v467_v10 }
  0x17   :  { %421 = vmatpush3.bf16.msra.mxu0 %v468_v13  ;;  %451 = vmatpush3.bf16.msra.mxu1 %v468_v13 }
  0x18   :  { %422 = vmatprep.subr.bf16.mxu0 %v469_v14  ;;  %444 = vmatprep.subr.bf16.mxu1 %v469_v14 }
  0x1b   :  { %423 = vmatpush3.bf16.msra.mxu0 %v470_v15  ;;  %452 = vmatpush3.bf16.msra.mxu1 %v470_v15  ;;  %v262_v15 = vld [vmem:[%s629_s1 + $0x18] sm:$0xff] }
  0x1c   :  { %424 = vmatprep.subr.bf16.mxu0 %v471_v16  ;;  %445 = vmatprep.subr.bf16.mxu1 %v471_v16 }
  0x1f   :  { %425 = vmatpush3.bf16.msra.mxu0 %v472_v17  ;;  %453 = vmatpush3.bf16.msra.mxu1 %v472_v17 }
  0x22   :  { %203 = vmatmul.mubr.bf16.vlgmr.msra.gmra.mrb[0].mxu0 %v473_v18  ;;  %211 = vmatmul.mubr.bf16.vlgmr.msra.gmra.mrb[0].mxu1 %v476_v19  ;;  %v275_v18 = vld [vmem:[%s630_s2] sm:$0xff] }
  0xf5   :  { %v426_v20 = vpop.f32.mrb[0].mxu0  ;;  %v432_v21 = vpop.f32.mrb[0].mxu1 }
  0xf6   :  { %v427_v22 = vpop.f32.mrb[1].mxu0  ;;  %v433_v23 = vpop.f32.mrb[1].mxu1 }
  0xf7   :  { %v573_v24 = vadd.f32 %v427_v22, %v426_v20  ;;  %v575_v25 = vadd.f32 %v433_v23, %v432_v21  ;;  %v429_v26 = vpop.f32.mrb[2].mxu0  ;;  %v435_v27 = vpop.f32.mrb[2].mxu1  ;;  %v277_v21 = vld [vmem:[%s630_s2 + $0x10] sm:$0xff] }
  0xf8   :  { %v430_v28 = vpop.f32.mrb[3].mxu0  ;;  %v436_v29 = vpop.f32.mrb[3].mxu1 }
  0xf9   :  { %v577_v30 = vadd.f32 %v430_v28, %v429_v26  ;;  %223 = vadd.xlane.f32.xlu1 %v575_v25  ;;  %219 = vadd.xlane.f32.xlu0 %v573_v24  ;;  %v581_v31 = vadd.f32 %v436_v29, %v435_v27  ;;  %v227_v33 = vmul.f32 %v573_v24, %v573_v24  ;;  %v276_v26 = vld [vmem:[%s630_s2 + $0x8] sm:$0xff]  ;;  %v278_v29 = vld [vmem:[%s630_s2 + $0x18] sm:$0xff] }
  0xfa   :  { %v229_v35 = vmul.f32 %v575_v25, %v575_v25 }
  0xfb   :  { %v228_v32 = vmul.f32 %v577_v30, %v577_v30  ;;  %v230_v34 = vmul.f32 %v581_v31, %v581_v31 }
  0xfd   :  { %225 = vadd.xlane.f32.xlu1 %v581_v31  ;;  %221 = vadd.xlane.f32.xlu0 %v577_v30 }
 0x101   :  { %233 = vadd.xlane.f32.xlu1 %v228_v32  ;;  %231 = vadd.xlane.f32.xlu0 %v227_v33 }
 0x105   :  { %237 = vadd.xlane.f32.xlu1 %v230_v34  ;;  %235 = vadd.xlane.f32.xlu0 %v229_v35 }
 0x186   :  { %v224_v37 = vpop.xlane.xlu1 %223  ;;  %v220_v38 = vpop.xlane.xlu0 %219 }
 0x187   :  { %v239_v41 = vmul.f32 0.03125, %v220_v38  ;;  %v241_v45 = vmul.f32 0.03125, %v224_v37 }
 0x189   :  { %v247_v46 = vmul.f32 %v239_v41, %v239_v41  ;;  %v249_v55 = vmul.f32 %v241_v45, %v241_v45 }
 0x18a   :  { %v226_v39 = vpop.xlane.xlu1 %225  ;;  %v222_v40 = vpop.xlane.xlu0 %221 }
 0x18b   :  { %v240_v42 = vmul.f32 0.03125, %v222_v40  ;;  %v242_v49 = vmul.f32 0.03125, %v226_v39 }
 0x18d   :  { %v248_v50 = vmul.f32 %v240_v42, %v240_v42  ;;  %v250_v59 = vmul.f32 %v242_v49, %v242_v49 }
 0x18e   :  { %v234_v43 = vpop.xlane.xlu1 %233  ;;  %v232_v44 = vpop.xlane.xlu0 %231 }
 0x18f   :  { %v244_v47 = vmul.f32 0.03125, %v234_v43  ;;  %v243_v48 = vmul.f32 0.03125, %v232_v44 }
 0x191   :  { %v251_v51 = vsub.f32 %v243_v48, %v247_v46  ;;  %v252_v52 = vsub.f32 %v244_v47, %v248_v50 }
 0x192   :  { %v238_v53 = vpop.xlane.xlu1 %237  ;;  %v236_v54 = vpop.xlane.xlu0 %235 }
 0x193   :  { %v255_v56 = vmax.f32 %v251_v51, 0.0  ;;  %v246_v57 = vmul.f32 0.03125, %v238_v53  ;;  %v245_v58 = vmul.f32 0.03125, %v236_v54  ;;  %v256_v62 = vmax.f32 %v252_v52, 0.0 }
 0x195   :  { %v263_v60 = vadd.f32 1e-05, %v255_v56  ;;  %v253_v61 = vsub.f32 %v245_v58, %v249_v55  ;;  %v254_v63 = vsub.f32 %v246_v57, %v250_v59  ;;  %v264_v2 = vadd.f32 1e-05, %v256_v62 }
 0x197   :  { %v257_v0 = vmax.f32 %v253_v61, 0.0  ;;  %479 = vrsqrt.f32 %v263_v60  ;;  %v258_v3 = vmax.f32 %v254_v63, 0.0 }
 0x199   :  { %v265_v1 = vadd.f32 1e-05, %v257_v0  ;;  %v266_v4 = vadd.f32 1e-05, %v258_v3 }
 0x19b   :  { %481 = vrsqrt.f32 %v265_v1 }
 0x19c   :  { %483 = vrsqrt.f32 %v264_v2 }
 0x19d   :  { %485 = vrsqrt.f32 %v266_v4 }
 0x1a1   :  { %v480_v6 = vpop.eup %479 }
 0x1a2   :  { %v271_v7 = vmul.f32 %v480_v6, %v259_v5 }
 0x1a4   :  { %289 = vperm.xlu0 %455, %v271_v7   ;;  %v279_v17 = vmul.f32 %v271_v7, %v239_v41 }
 0x1a5   :  { %v482_v9 = vpop.eup %481 }
 0x1a6   :  { %v273_v10 = vmul.f32 %v482_v9, %v261_v8  ;;  %v484_v11 = vpop.eup %483  ;;  %v283_v19 = vsub.f32 %v275_v18, %v279_v17 }
 0x1a7   :  { %v272_v13 = vmul.f32 %v484_v11, %v260_v12  ;;  %v486_v14 = vpop.eup %485 }
 0x1a8   :  { %299 = vperm.xlu1 %456, %v273_v10   ;;  %v274_v16 = vmul.f32 %v486_v14, %v262_v15  ;;  %v281_v20 = vmul.f32 %v273_v10, %v241_v45 }
 0x1a9   :  { %v280_v23 = vmul.f32 %v272_v13, %v240_v42 }
 0x1aa   :  { %v285_v22 = vsub.f32 %v277_v21, %v281_v20  ;;  %v282_v28 = vmul.f32 %v274_v16, %v242_v49 }
 0x1ab   :  { %v284_v27 = vsub.f32 %v276_v26, %v280_v23 }
 0x1ac   :  { %294 = vperm.xlu1 %456, %v272_v13   ;;  %v286_v32 = vsub.f32 %v278_v29, %v282_v28 }
 0x1b0   :  { %304 = vperm.xlu1 %456, %v274_v16  }
 0x1b4   :  { %313 = vperm.xlu1 %456, %v283_v19  }
 0x1b8   :  { %323 = vperm.xlu1 %456, %v285_v22  }
 0x1bc   :  { %318 = vperm.xlu1 %456, %v284_v27  }
 0x1c0   :  { %328 = vperm.xlu1 %456, %v286_v32  }
 0x223   :  { %v290_v36 = vpop.permute.xlu0 %289 }
 0x224   :  { %v307_v38 = vmul.f32 %v573_v24, %v290_v36 }
 0x227   :  { %v300_v33 = vpop.permute.xlu1 %299 }
 0x228   :  { %v309_v41 = vmul.f32 %v575_v25, %v300_v33 }
 0x22b   :  { %v295_v34 = vpop.permute.xlu1 %294 }
 0x22c   :  { %v308_v42 = vmul.f32 %v577_v30, %v295_v34 }
 0x22f   :  { %v305_v35 = vpop.permute.xlu1 %304 }
 0x230   :  { %v310_v47 = vmul.f32 %v581_v31, %v305_v35 }
 0x233   :  { %v314_v37 = vpop.permute.xlu1 %313 }
 0x234   :  { %v331_v40 = vadd.f32 %v314_v37, %v307_v38 }
 0x236   :  { %v339_v44 = vmul.f32 0.2, %v331_v40  ;;  %vm335_vm0 = vcmp.ge.f32.partialorder %v331_v40, 0.0 }
 0x237   :  { %v324_v39 = vpop.permute.xlu1 %323 }
 0x238   :  { %v333_v45 = vadd.f32 %v324_v39, %v309_v41  ;;  %v343_v50 = vsel %vm335_vm0, %v331_v40, %v339_v44 }
 0x23a   :  { %v341_v51 = vmul.f32 0.2, %v333_v45  ;;  %vm337_vm2 = vcmp.ge.f32.partialorder %v333_v45, 0.0 }
 0x23b   :  { %v319_v43 = vpop.permute.xlu1 %318 }
 0x23c   :  { %v332_v46 = vadd.f32 %v319_v43, %v308_v42  ;;  %v345_v30 = vsel %vm337_vm2, %v333_v45, %v341_v51 }
 0x23e   :  { %vm336_vm1 = vcmp.ge.f32.partialorder %v332_v46, 0.0  ;;  %v340_v48 = vmul.f32 0.2, %v332_v46 }
 0x23f   :  { %v329_v49 = vpop.permute.xlu1 %328 }
 0x240   :  { %v344_v52 = vsel %vm336_vm1, %v332_v46, %v340_v48  ;;  %v334_v24 = vadd.f32 %v329_v49, %v310_v47 }
 0x241   :  { %v402_v53 = vpack.c.bf16 %v344_v52, %v343_v50 }
 0x242   :  { %vm338_vm3 = vcmp.ge.f32.partialorder %v334_v24, 0.0  ;;  %v342_v25 = vmul.f32 0.2, %v334_v24 }
 0x243   :  { %403 = vst [vmem:[%s631_s4] sm:$0xff] %v402_v53  }
 0x244   :  { %v346_v54 = vsel %vm338_vm3, %v334_v24, %v342_v25 }
 0x245   :  { %v407_v55 = vpack.c.bf16 %v346_v54, %v345_v30 }
 0x247   :  { %409 = vst [vmem:[%s631_s4 + $0x8] sm:$0xff] %v407_v55  }

// kernel: _lambda_.9
= control target key start
LH: loop header
LB: loop body
LE: loop exit
PB: predicated region body
PF: predicated region fallthrough
CT: control target
= control target key end

     0   :  { %vm238_vm0 = vcmask 261120   ;;  %s929_s3 = inlined_call_operand.vmem [shape: bf16[288,128], index: 3, kind: input, shape index: {}]   ;;  %s930_s0 = inlined_call_operand.vmem [shape: bf16[64,288], index: 0, kind: input, shape index: {}]   ;;  %s931_s1 = inlined_call_operand.vmem [shape: f32[16,1], index: 1, kind: input, shape index: {}]   ;;  %s932_s2 = inlined_call_operand.vmem [shape: f32[16,1], index: 2, kind: input, shape index: {}]   ;;  %s933_s4 = inlined_call_operand.vmem [shape: bf16[64,128], index: 4, kind: output, shape index: {}]  }
   0x1   :  { %v699_v0 = vld [vmem:[%s929_s3 + $0x40] sm:$0xff]   ;;  %v701_v2 = vld [vmem:[%s929_s3 + $0x48] sm:$0xff]   ;;  %v703_v4 = vld [vmem:[%s929_s3 + $0x50] sm:$0xff]  }
   0x2   :  { %v700_v1 = vld [vmem:[%s929_s3] sm:$0xff]   ;;  %622 = vmatprep.subr.bf16.mxu0 %v699_v0  ;;  %680 = vmatprep.subr.bf16.mxu1 %v699_v0  ;;  %v702_v3 = vld [vmem:[%s929_s3 + $0x8] sm:$0xff]   ;;  %v704_v5 = vld [vmem:[%s929_s3 + $0x10] sm:$0xff]  }
   0x3   :  { %623 = vmatpush3.bf16.msra.mxu0 %v700_v1  ;;  %688 = vmatpush3.bf16.msra.mxu1 %v700_v1  ;;  %v705_v6 = vld [vmem:[%s929_s3 + $0x58] sm:$0xff]   ;;  %v707_v8 = vld [vmem:[%s929_s3 + $0x60] sm:$0xff]   ;;  %v709_v10 = vld [vmem:[%s929_s3 + $0x68] sm:$0xff]  }
   0x4   :  { %624 = vmatprep.subr.bf16.mxu0 %v701_v2  ;;  %681 = vmatprep.subr.bf16.mxu1 %v701_v2  ;;  %v706_v7 = vld [vmem:[%s929_s3 + $0x18] sm:$0xff]   ;;  %v708_v9 = vld [vmem:[%s929_s3 + $0x20] sm:$0xff]   ;;  %v710_v13 = vld [vmem:[%s929_s3 + $0x28] sm:$0xff]  }
   0x5   :  { %v717_v11 = vld [vmem:[%s930_s0 + $0x4] ss:$12 sps:$4 sm:$0xff]   ;;  %v720_v12 = vld [vmem:[%s930_s0 + $0x4c] ss:$12 sps:$4 sm:$0xff]   ;;  %v718_v20 = vld [vmem:[%s930_s0 + $0x48] ss:$12 sps:$4 sm:$0xff]  }
   0x6   :  { %v711_v14 = vld [vmem:[%s929_s3 + $0x70] sm:$0xff]   ;;  %283 = vmatprep.mubr.bf16.mxu0 %v717_v11  ;;  %307 = vmatprep.mubr.bf16.mxu1 %v720_v12  ;;  %v713_v16 = vld [vmem:[%s929_s3 + $0x78] sm:$0xff]   ;;  %v721_v18 = vld [vmem:[%s929_s3 + $0x80] sm:$0xff]  }
   0x7   :  { %625 = vmatpush3.bf16.msra.mxu0 %v702_v3  ;;  %689 = vmatpush3.bf16.msra.mxu1 %v702_v3  ;;  %v712_v15 = vld [vmem:[%s929_s3 + $0x30] sm:$0xff]   ;;  %v714_v17 = vld [vmem:[%s929_s3 + $0x38] sm:$0xff]   ;;  %v715_v19 = vld [vmem:[%s930_s0] ss:$12 sps:$4 sm:$0xff]  }
   0x8   :  { %626 = vmatprep.subr.bf16.mxu0 %v703_v4  ;;  %682 = vmatprep.subr.bf16.mxu1 %v703_v4  ;;  %v723_v21 = vld [vmem:[%s930_s0 + $0x1c] ss:$12 sps:$4 sm:$0xff]   ;;  %v726_v24 = vld [vmem:[%s930_s0 + $0x18] ss:$12 sps:$4 sm:$0xff]   ;;  %v727_v25 = vld [vmem:[%s930_s0 + $0x20] ss:$12 sps:$4 sm:$0xff]  }
   0x9   :  { %v722_v22 = vld [vmem:[%s929_s3 + $0x88] sm:$0xff]   ;;  %v728_v26 = vld [vmem:[%s930_s0 + $0x38] ss:$12 sps:$4 sm:$0xff]   ;;  %v730_v27 = vld [vmem:[%s930_s0 + $0x34] ss:$12 sps:$4 sm:$0xff]  }
   0xa   :  { %v725_v23 = vld [vmem:[%s930_s0 + $0x8] ss:$12 sps:$4 sm:$0xff]   ;;  %v729_v28 = vld [vmem:[%s930_s0 + $0x50] ss:$12 sps:$4 sm:$0xff]  }
   0xb   :  { %627 = vmatpush3.bf16.msra.mxu0 %v704_v5  ;;  %690 = vmatpush3.bf16.msra.mxu1 %v704_v5  ;;  %v732_v29 = vld [vmem:[%s930_s0 + $0x30] ss:$12 sps:$4 sm:$0xff]  }
   0xc   :  { %628 = vmatprep.subr.bf16.mxu0 %v705_v6  ;;  %683 = vmatprep.subr.bf16.mxu1 %v705_v6 }
   0xf   :  { %629 = vmatpush3.bf16.msra.mxu0 %v706_v7  ;;  %691 = vmatpush3.bf16.msra.mxu1 %v706_v7 }
  0x10   :  { %630 = vmatprep.subr.bf16.mxu0 %v707_v8  ;;  %684 = vmatprep.subr.bf16.mxu1 %v707_v8 }
  0x13   :  { %631 = vmatpush3.bf16.msra.mxu0 %v708_v9  ;;  %692 = vmatpush3.bf16.msra.mxu1 %v708_v9 }
  0x14   :  { %632 = vmatprep.subr.bf16.mxu0 %v709_v10  ;;  %685 = vmatprep.subr.bf16.mxu1 %v709_v10 }
  0x17   :  { %633 = vmatpush3.bf16.msra.mxu0 %v710_v13  ;;  %693 = vmatpush3.bf16.msra.mxu1 %v710_v13 }
  0x18   :  { %634 = vmatprep.subr.bf16.mxu0 %v711_v14  ;;  %686 = vmatprep.subr.bf16.mxu1 %v711_v14  ;;  %v737_v14 = vmov 0  }
  0x19   :  { %697 = vset.pattern.permute.xlu0 %v737_v14  ;;  %698 = vset.pattern.permute.xlu1 %v737_v14 }
  0x1b   :  { %635 = vmatpush3.bf16.msra.mxu0 %v712_v15  ;;  %694 = vmatpush3.bf16.msra.mxu1 %v712_v15 }
  0x1c   :  { %636 = vmatprep.subr.bf16.mxu0 %v713_v16  ;;  %687 = vmatprep.subr.bf16.mxu1 %v713_v16 }
  0x1f   :  { %637 = vmatpush3.bf16.msra.mxu0 %v714_v17  ;;  %695 = vmatpush3.bf16.msra.mxu1 %v714_v17 }
  0x20   :  { %668 = vmatprep.subr.bf16.mxu1 %v721_v18 }
  0x22   :  { %284 = vmatmul.mubr.bf16.vlgmr.msra.gmra.mrb[0].mxu0 %v715_v19  ;;  %308 = vmatmul.mubr.bf16.vlgmr.msra.gmra.mrb[0].mxu1 %v718_v20 }
  0x23   :  { %669 = vmatpush3.bf16.msra.mxu1 %v721_v18  ;;  %291 = vmatprep.mubr.bf16.mxu0 %v723_v21 }
  0x24   :  { %670 = vmatprep.subr.bf16.mxu1 %v722_v22  ;;  %672 = vmatprep.mubr.msk.bf16.mxu1 %vm238_vm0, %v725_v23 }
  0x27   :  { %671 = vmatpush3.bf16.msra.mxu1 %v722_v22 }
  0x2a   :  { %292 = vmatmul.mubr.bf16.gmra.mrb[4].mxu0 %v726_v24  ;;  %673 = vmatmul.mubr.msk.bf16.vlgmr.msra.gmra.mrb[4].mxu1 %vm238_vm0, %v727_v25 }
  0x2b   :  { %676 = vmatprep.mubr.msk.bf16.mxu1 %vm238_vm0, %v728_v26  ;;  %299 = vmatprep.mubr.bf16.mxu0 %v730_v27 }
  0x32   :  { %677 = vmatmul.mubr.msk.bf16.gmra.mrb[8].mxu1 %vm238_vm0, %v729_v28  ;;  %300 = vmatmul.mubr.bf16.gmra.mrb[8].mxu0 %v732_v29 }
  0xf5   :  { %v638_v30 = vpop.f32.mrb[0].mxu0  ;;  %v656_v31 = vpop.f32.mrb[0].mxu1 }
  0xf6   :  { %v639_v32 = vpop.f32.mrb[1].mxu0  ;;  %v657_v33 = vpop.f32.mrb[1].mxu1 }
  0xf7   :  { %v640_v34 = vadd.f32 %v639_v32, %v638_v30  ;;  %v658_v35 = vadd.f32 %v657_v33, %v656_v31  ;;  %v641_v36 = vpop.f32.mrb[2].mxu0  ;;  %v659_v37 = vpop.f32.mrb[2].mxu1 }
  0xf8   :  { %v642_v38 = vpop.f32.mrb[3].mxu0  ;;  %v660_v39 = vpop.f32.mrb[3].mxu1 }
  0xf9   :  { %v643_v40 = vadd.f32 %v642_v38, %v641_v36  ;;  %v661_v41 = vadd.f32 %v660_v39, %v659_v37 }
  0xfd   :  { %v644_v42 = vpop.f32.mrb[4].mxu0  ;;  %v674_v43 = vpop.f32.mrb[4].mxu1 }
  0xfe   :  { %v645_v44 = vpop.f32.mrb[5].mxu0  ;;  %v350_v45 = vpop.f32.mrb[5].mxu1 }
  0xff   :  { %v646_v46 = vadd.f32 %v645_v44, %v644_v42  ;;  %v857_v47 = vadd.f32 %v640_v34, %v350_v45  ;;  %v647_v48 = vpop.f32.mrb[6].mxu0  ;;  %v675_v49 = vpop.f32.mrb[6].mxu1 }
 0x100   :  { %v648_v50 = vpop.f32.mrb[7].mxu0  ;;  %v353_v51 = vpop.f32.mrb[7].mxu1 }
 0x101   :  { %v859_v52 = vadd.f32 %v674_v43, %v646_v46  ;;  %v649_v53 = vadd.f32 %v648_v50, %v647_v48  ;;  %v861_v54 = vadd.f32 %v643_v40, %v353_v51  ;;  %381 = vadd.xlane.f32.xlu0 %v857_v47  ;;  %v397_v62 = vmul.f32 %v857_v47, %v857_v47 }
 0x103   :  { %v864_v55 = vadd.f32 %v675_v49, %v649_v53  ;;  %385 = vadd.xlane.f32.xlu1 %v859_v52  ;;  %v398_v5 = vmul.f32 %v861_v54, %v861_v54  ;;  %v399_v7 = vmul.f32 %v859_v52, %v859_v52 }
 0x105   :  { %v678_v56 = vpop.f32.mrb[8].mxu1  ;;  %383 = vadd.xlane.f32.xlu0 %v861_v54  ;;  %v650_v57 = vpop.f32.mrb[8].mxu0  ;;  %v400_v9 = vmul.f32 %v864_v55, %v864_v55 }
 0x106   :  { %v868_v58 = vadd.f32 %v678_v56, %v658_v35  ;;  %v366_v59 = vpop.f32.mrb[9].mxu1  ;;  %v651_v60 = vpop.f32.mrb[9].mxu0 }
 0x107   :  { %v679_v61 = vpop.f32.mrb[10].mxu1  ;;  %387 = vadd.xlane.f32.xlu1 %v864_v55  ;;  %v652_v63 = vadd.f32 %v651_v60, %v650_v57  ;;  %v653_v0 = vpop.f32.mrb[10].mxu0  ;;  %v447_v60 = vld [vmem:[%s931_s1] sm:$0xff] }
 0x108   :  { %v873_v1 = vadd.f32 %v679_v61, %v661_v41  ;;  %v654_v2 = vpop.f32.mrb[11].mxu0  ;;  %v369_v3 = vpop.f32.mrb[11].mxu1  ;;  %v403_v12 = vmul.f32 %v868_v58, %v868_v58 }
 0x109   :  { %405 = vadd.xlane.f32.xlu0 %v397_v62  ;;  %v875_v4 = vadd.f32 %v652_v63, %v366_v59  ;;  %v655_v6 = vadd.f32 %v654_v2, %v653_v0  ;;  %v448_v62 = vld [vmem:[%s931_s1 + $0x8] sm:$0xff] }
 0x10a   :  { %v404_v13 = vmul.f32 %v873_v1, %v873_v1 }
 0x10b   :  { %407 = vadd.xlane.f32.xlu1 %v398_v5  ;;  %v881_v8 = vadd.f32 %v655_v6, %v369_v3  ;;  %v401_v10 = vmul.f32 %v875_v4, %v875_v4  ;;  %v455_v5 = vld [vmem:[%s932_s2] sm:$0xff] }
 0x10d   :  { %409 = vadd.xlane.f32.xlu0 %v399_v7  ;;  %v402_v11 = vmul.f32 %v881_v8, %v881_v8 }
 0x10f   :  { %411 = vadd.xlane.f32.xlu1 %v400_v9  ;;  %v456_v9 = vld [vmem:[%s932_s2 + $0x8] sm:$0xff] }
 0x111   :  { %393 = vadd.xlane.f32.xlu0 %v868_v58 }
 0x113   :  { %395 = vadd.xlane.f32.xlu1 %v873_v1 }
 0x115   :  { %389 = vadd.xlane.f32.xlu0 %v875_v4 }
 0x117   :  { %391 = vadd.xlane.f32.xlu1 %v881_v8 }
 0x119   :  { %413 = vadd.xlane.f32.xlu0 %v401_v10 }
 0x11b   :  { %415 = vadd.xlane.f32.xlu1 %v402_v11 }
 0x11d   :  { %417 = vadd.xlane.f32.xlu0 %v403_v12 }
 0x11f   :  { %419 = vadd.xlane.f32.xlu1 %v404_v13 }
 0x18e   :  { %v382_v15 = vpop.xlane.xlu0 %381 }
 0x190   :  { %v386_v16 = vpop.xlane.xlu1 %385 }
 0x191   :  { %v423_v25 = vadd.f32 %v386_v16, %v382_v15 }
 0x192   :  { %v384_v17 = vpop.xlane.xlu0 %383 }
 0x194   :  { %v388_v18 = vpop.xlane.xlu1 %387 }
 0x195   :  { %v424_v27 = vadd.f32 %v388_v18, %v384_v17 }
 0x196   :  { %v406_v19 = vpop.xlane.xlu0 %405 }
 0x198   :  { %v408_v20 = vpop.xlane.xlu1 %407 }
 0x19a   :  { %v410_v21 = vpop.xlane.xlu0 %409 }
 0x19b   :  { %v431_v33 = vadd.f32 %v410_v21, %v406_v19 }
 0x19c   :  { %v412_v22 = vpop.xlane.xlu1 %411 }
 0x19d   :  { %v432_v36 = vadd.f32 %v412_v22, %v408_v20 }
 0x19e   :  { %v394_v23 = vpop.xlane.xlu0 %393 }
 0x1a0   :  { %v396_v24 = vpop.xlane.xlu1 %395 }
 0x1a2   :  { %v390_v26 = vpop.xlane.xlu0 %389 }
 0x1a3   :  { %v425_v28 = vadd.f32 %v423_v25, %v390_v26 }
 0x1a4   :  { %v392_v29 = vpop.xlane.xlu1 %391 }
 0x1a5   :  { %v427_v30 = vadd.f32 %v425_v28, %v394_v23  ;;  %v426_v31 = vadd.f32 %v424_v27, %v392_v29 }
 0x1a6   :  { %v414_v32 = vpop.xlane.xlu0 %413 }
 0x1a7   :  { %v428_v34 = vadd.f32 %v426_v31, %v396_v24  ;;  %v437_v37 = vmul.f32 0.0078125, %v427_v30  ;;  %v433_v38 = vadd.f32 %v431_v33, %v414_v32 }
 0x1a8   :  { %v416_v35 = vpop.xlane.xlu1 %415 }
 0x1a9   :  { %v438_v40 = vmul.f32 0.0078125, %v428_v34  ;;  %v434_v41 = vadd.f32 %v432_v36, %v416_v35  ;;  %v441_v44 = vmul.f32 %v437_v37, %v437_v37 }
 0x1aa   :  { %v418_v39 = vpop.xlane.xlu0 %417 }
 0x1ab   :  { %v435_v42 = vadd.f32 %v433_v38, %v418_v39  ;;  %v442_v50 = vmul.f32 %v438_v40, %v438_v40 }
 0x1ac   :  { %v420_v43 = vpop.xlane.xlu1 %419 }
 0x1ad   :  { %v439_v45 = vmul.f32 0.0078125, %v435_v42  ;;  %v436_v46 = vadd.f32 %v434_v41, %v420_v43 }
 0x1af   :  { %v443_v48 = vsub.f32 %v439_v45, %v441_v44  ;;  %v440_v49 = vmul.f32 0.0078125, %v436_v46 }
 0x1b1   :  { %v445_v51 = vmax.f32 %v443_v48, 0.0  ;;  %v444_v53 = vsub.f32 %v440_v49, %v442_v50 }
 0x1b3   :  { %v449_v56 = vadd.f32 1e-05, %v445_v51  ;;  %v446_v57 = vmax.f32 %v444_v53, 0.0 }
 0x1b5   :  { %733 = vrsqrt.f32 %v449_v56  ;;  %v450_v59 = vadd.f32 1e-05, %v446_v57 }
 0x1b7   :  { %735 = vrsqrt.f32 %v450_v59 }
 0x1bf   :  { %v734_v61 = vpop.eup %733 }
 0x1c0   :  { %v453_v63 = vmul.f32 %v734_v61, %v447_v60 }
 0x1c1   :  { %v736_v0 = vpop.eup %735 }
 0x1c2   :  { %463 = vperm.xlu0 %697, %v453_v63   ;;  %v454_v2 = vmul.f32 %v736_v0, %v448_v62  ;;  %v457_v3 = vmul.f32 %v453_v63, %v437_v37 }
 0x1c4   :  { %468 = vperm.xlu1 %698, %v454_v2   ;;  %v459_v6 = vsub.f32 %v455_v5, %v457_v3  ;;  %v458_v7 = vmul.f32 %v454_v2, %v438_v40 }
 0x1c6   :  { %v460_v10 = vsub.f32 %v456_v9, %v458_v7 }
 0x1c8   :  { %475 = vperm.xlu1 %698, %v459_v6  }
 0x1cc   :  { %480 = vperm.xlu1 %698, %v460_v10  }
 0x241   :  { %v464_v12 = vpop.permute.xlu0 %463 }
 0x242   :  { %v471_v13 = vmul.f32 %v464_v12, %v857_v47  ;;  %v497_v14 = vmul.f32 %v464_v12, %v859_v52  ;;  %v513_v15 = vmul.f32 %v464_v12, %v875_v4  ;;  %v529_v16 = vmul.f32 %v464_v12, %v868_v58 }
 0x243   :  { %v469_v11 = vpop.permute.xlu1 %468 }
 0x244   :  { %v472_v22 = vmul.f32 %v469_v11, %v861_v54  ;;  %v498_v23 = vmul.f32 %v469_v11, %v864_v55  ;;  %v514_v24 = vmul.f32 %v469_v11, %v881_v8  ;;  %v530_v25 = vmul.f32 %v469_v11, %v873_v1 }
 0x247   :  { %v476_v17 = vpop.permute.xlu1 %475 }
 0x248   :  { %v483_v18 = vadd.f32 %v476_v17, %v471_v13  ;;  %v499_v19 = vadd.f32 %v497_v14, %v476_v17  ;;  %v515_v20 = vadd.f32 %v513_v15, %v476_v17  ;;  %v531_v21 = vadd.f32 %v529_v16, %v476_v17 }
 0x24a   :  { %v485_v28 = vmax.f32 %v483_v18, 0.0  ;;  %v501_v58 = vmax.f32 %v499_v19, 0.0  ;;  %v517_v29 = vmax.f32 %v515_v20, 0.0  ;;  %v533_v30 = vmax.f32 %v531_v21, 0.0 }
 0x24b   :  { %v481_v47 = vpop.permute.xlu1 %480 }
 0x24c   :  { %v484_v26 = vadd.f32 %v481_v47, %v472_v22  ;;  %v500_v52 = vadd.f32 %v498_v23, %v481_v47  ;;  %v516_v27 = vadd.f32 %v514_v24, %v481_v47  ;;  %v532_v4 = vadd.f32 %v530_v25, %v481_v47 }
 0x24e   :  { %v486_v31 = vmax.f32 %v484_v26, 0.0  ;;  %v502_v32 = vmax.f32 %v500_v52, 0.0  ;;  %v518_v33 = vmax.f32 %v516_v27, 0.0  ;;  %v534_v34 = vmax.f32 %v532_v4, 0.0 }
 0x250   :  { %v602_v54 = vpack.c.bf16 %v486_v31, %v485_v28  ;;  %v607_v35 = vpack.c.bf16 %v502_v32, %v501_v58  ;;  %v612_v55 = vpack.c.bf16 %v518_v33, %v517_v29  ;;  %v617_v36 = vpack.c.bf16 %v534_v34, %v533_v30 }
 0x252   :  { %603 = vst [vmem:[%s933_s4] sm:$0xff] %v602_v54   ;;  %619 = vst [vmem:[%s933_s4 + $0x8] sm:$0xff] %v607_v35  }
 0x253   :  { %620 = vst [vmem:[%s933_s4 + $0x10] sm:$0xff] %v612_v55   ;;  %621 = vst [vmem:[%s933_s4 + $0x18] sm:$0xff] %v617_v36  }

// kernel: _lambda_.10
= control target key start
LH: loop header
LB: loop body
LE: loop exit
PB: predicated region body
PF: predicated region fallthrough
CT: control target
= control target key end

     0   :  { %v466_v0 = vmov 0   ;;  %vm140_vm0 = vcmask 130048   ;;  %s602_s5 = inlined_call_operand.vmem [shape: bf16[144,128], index: 5, kind: input, shape index: {}]   ;;  %s603_s4 = inlined_call_operand.vmem [shape: bf16[144,128], index: 4, kind: input, shape index: {}]   ;;  %s604_s1 = inlined_call_operand.vmem [shape: bf16[32,144], index: 1, kind: input, shape index: {}]   ;;  %s605_s0 = inlined_call_operand.vmem [shape: bf16[32,144], index: 0, kind: input, shape index: {}]   ;;  %s606_s2 = inlined_call_operand.vmem [shape: f32[8,1], index: 2, kind: input, shape index: {}]   ;;  %s607_s3 = inlined_call_operand.vmem [shape: f32[8,1], index: 3, kind: input, shape index: {}]   ;;  %s608_s6 = inlined_call_operand.vmem [shape: bf16[32,128], index: 6, kind: output, shape index: {}]  }
   0x1   :  { %147 = vmatprep.subr.bf16.mxu1 %v466_v0  ;;  %274 = vmatprep.subr.bf16.mxu0 %v466_v0  ;;  %v434_v1 = vld [vmem:[%s602_s5] sm:$0xff]   ;;  %v436_v3 = vld [vmem:[%s602_s5 + $0x8] sm:$0xff]   ;;  %v438_v5 = vld [vmem:[%s602_s5 + $0x10] sm:$0xff]  }
   0x2   :  { %v435_v2 = vld [vmem:[%s603_s4] sm:$0xff]   ;;  %432 = vset.pattern.permute.xlu0 %v466_v0  ;;  %433 = vset.pattern.permute.xlu1 %v466_v0  ;;  %v437_v4 = vld [vmem:[%s603_s4 + $0x8] sm:$0xff]   ;;  %v439_v6 = vld [vmem:[%s603_s4 + $0x10] sm:$0xff]  }
   0x3   :  { %148 = vmatpush1.bf16.msra.mxu1 %v434_v1  ;;  %275 = vmatpush1.bf16.msra.mxu0 %v435_v2  ;;  %v440_v7 = vld [vmem:[%s602_s5 + $0x18] sm:$0xff]   ;;  %v442_v9 = vld [vmem:[%s602_s5 + $0x20] sm:$0xff]   ;;  %v444_v11 = vld [vmem:[%s602_s5 + $0x28] sm:$0xff]  }
   0x4   :  { %149 = vmatprep.subr.bf16.mxu1 %v466_v0  ;;  %276 = vmatprep.subr.bf16.mxu0 %v466_v0  ;;  %v441_v8 = vld [vmem:[%s603_s4 + $0x18] sm:$0xff]   ;;  %v443_v10 = vld [vmem:[%s603_s4 + $0x20] sm:$0xff]   ;;  %v445_v12 = vld [vmem:[%s603_s4 + $0x28] sm:$0xff]  }
   0x5   :  { %v454_v13 = vld [vmem:[%s604_s1 + $0x4] ss:$8 sps:$4 sm:$0xff]   ;;  %v446_v15 = vld [vmem:[%s602_s5 + $0x30] sm:$0xff]   ;;  %v448_v17 = vld [vmem:[%s602_s5 + $0x38] sm:$0xff]  }
   0x6   :  { %v457_v14 = vld [vmem:[%s605_s0 + $0x4] ss:$8 sps:$4 sm:$0xff]   ;;  %410 = vmatprep.mubr.msk.bf16.mxu1 %vm140_vm0, %v454_v13  ;;  %v447_v16 = vld [vmem:[%s603_s4 + $0x30] sm:$0xff]   ;;  %v449_v18 = vld [vmem:[%s603_s4 + $0x38] sm:$0xff]  }
   0x7   :  { %150 = vmatpush1.bf16.msra.mxu1 %v436_v3  ;;  %277 = vmatpush1.bf16.msra.mxu0 %v437_v4  ;;  %v450_v19 = vld [vmem:[%s602_s5 + $0x40] sm:$0xff]   ;;  %v458_v23 = vld [vmem:[%s604_s1 + $0x14] ss:$8 sps:$4 sm:$0xff]   ;;  %v462_v25 = vld [vmem:[%s604_s1 + $0x10] ss:$8 sps:$4 sm:$0xff]  }
   0x8   :  { %151 = vmatprep.subr.bf16.mxu1 %v466_v0  ;;  %278 = vmatprep.subr.bf16.mxu0 %v466_v0  ;;  %v451_v20 = vld [vmem:[%s603_s4 + $0x40] sm:$0xff]   ;;  %v460_v24 = vld [vmem:[%s605_s0 + $0x14] ss:$8 sps:$4 sm:$0xff]   ;;  %v463_v26 = vld [vmem:[%s605_s0 + $0x10] ss:$8 sps:$4 sm:$0xff]  }
   0x9   :  { %425 = vmatprep.mubr.msk.bf16.mxu0 %vm140_vm0, %v457_v14  ;;  %v452_v21 = vld [vmem:[%s604_s1] ss:$8 sps:$4 sm:$0xff]  }
   0xa   :  { %v455_v22 = vld [vmem:[%s605_s0] ss:$8 sps:$4 sm:$0xff]  }
   0xb   :  { %152 = vmatpush1.bf16.msra.mxu1 %v438_v5  ;;  %279 = vmatpush1.bf16.msra.mxu0 %v439_v6 }
   0xc   :  { %153 = vmatprep.subr.bf16.mxu1 %v466_v0  ;;  %280 = vmatprep.subr.bf16.mxu0 %v466_v0 }
   0xf   :  { %154 = vmatpush1.bf16.msra.mxu1 %v440_v7  ;;  %281 = vmatpush1.bf16.msra.mxu0 %v441_v8  ;;  %v356_v7 = vld [vmem:[%s606_s2] sm:$0xff] }
  0x10   :  { %155 = vmatprep.subr.bf16.mxu1 %v466_v0  ;;  %282 = vmatprep.subr.bf16.mxu0 %v466_v0 }
  0x13   :  { %156 = vmatpush1.bf16.msra.mxu1 %v442_v9  ;;  %283 = vmatpush1.bf16.msra.mxu0 %v443_v10  ;;  %v360_v10 = vld [vmem:[%s607_s3] sm:$0xff] }
  0x14   :  { %157 = vmatprep.subr.bf16.mxu1 %v466_v0  ;;  %284 = vmatprep.subr.bf16.mxu0 %v466_v0 }
  0x17   :  { %158 = vmatpush1.bf16.msra.mxu1 %v444_v11  ;;  %285 = vmatpush1.bf16.msra.mxu0 %v445_v12 }
  0x18   :  { %159 = vmatprep.subr.bf16.mxu1 %v466_v0  ;;  %286 = vmatprep.subr.bf16.mxu0 %v466_v0 }
  0x1b   :  { %160 = vmatpush1.bf16.msra.mxu1 %v446_v15  ;;  %287 = vmatpush1.bf16.msra.mxu0 %v447_v16 }
  0x1c   :  { %161 = vmatprep.subr.bf16.mxu1 %v466_v0  ;;  %288 = vmatprep.subr.bf16.mxu0 %v466_v0 }
  0x1f   :  { %162 = vmatpush1.bf16.msra.mxu1 %v448_v17  ;;  %289 = vmatpush1.bf16.msra.mxu0 %v449_v18 }
  0x20   :  { %163 = vmatprep.subr.bf16.mxu1 %v466_v0  ;;  %290 = vmatprep.subr.bf16.mxu0 %v466_v0 }
  0x23   :  { %164 = vmatpush1.bf16.msra.mxu1 %v450_v19  ;;  %291 = vmatpush1.bf16.msra.mxu0 %v451_v20 }
  0x26   :  { %180 = vmatmul.mubr.bf16.vlgmr.msra.gmra.mrb[0].mxu1 %v452_v21  ;;  %307 = vmatmul.mubr.bf16.vlgmr.msra.gmra.mrb[0].mxu0 %v455_v22 }
  0x27   :  { %411 = vmatprep.mubr.msk.bf16.mxu1 %vm140_vm0, %v458_v23  ;;  %426 = vmatprep.mubr.msk.bf16.mxu0 %vm140_vm0, %v460_v24 }
  0x2e   :  { %188 = vmatmul.mubr.bf16.gmra.mrb[4].mxu1 %v462_v25  ;;  %315 = vmatmul.mubr.bf16.gmra.mrb[4].mxu0 %v463_v26 }
  0xf9   :  { %v181_v27 = vpop.f32.mrb[0].mxu1  ;;  %v308_v28 = vpop.f32.mrb[0].mxu0 }
  0xfa   :  { %v183_v29 = vpop.f32.mrb[1].mxu1  ;;  %v309_v30 = vadd.f32 %v308_v28, %v181_v27  ;;  %v310_v31 = vpop.f32.mrb[1].mxu0 }
  0xfb   :  { %v184_v32 = vpop.f32.mrb[2].mxu1  ;;  %v311_v33 = vpop.f32.mrb[2].mxu0 }
  0xfc   :  { %v186_v34 = vpop.f32.mrb[3].mxu1  ;;  %v312_v35 = vadd.f32 %v311_v33, %v184_v32  ;;  %v313_v36 = vpop.f32.mrb[3].mxu0  ;;  %323 = vadd.xlane.f32.xlu0 %v309_v30  ;;  %v331_v37 = vmul.f32 %v309_v30, %v309_v30 }
  0xfe   :  { %335 = vadd.xlane.f32.xlu1 %v331_v37  ;;  %v332_v44 = vmul.f32 %v312_v35, %v312_v35 }
 0x100   :  { %325 = vadd.xlane.f32.xlu0 %v312_v35 }
 0x101   :  { %v189_v38 = vpop.f32.mrb[4].mxu1  ;;  %v316_v39 = vpop.f32.mrb[4].mxu0 }
 0x102   :  { %v191_v40 = vpop.f32.mrb[5].mxu1  ;;  %v317_v41 = vadd.f32 %v316_v39, %v189_v38  ;;  %v318_v42 = vpop.f32.mrb[5].mxu0 }
 0x103   :  { %v192_v43 = vpop.f32.mrb[6].mxu1  ;;  %v319_v45 = vpop.f32.mrb[6].mxu0 }
 0x104   :  { %v194_v46 = vpop.f32.mrb[7].mxu1  ;;  %v320_v47 = vadd.f32 %v319_v45, %v192_v43  ;;  %v321_v48 = vpop.f32.mrb[7].mxu0  ;;  %337 = vadd.xlane.f32.xlu0 %v332_v44  ;;  %327 = vadd.xlane.f32.xlu1 %v317_v41  ;;  %v333_v49 = vmul.f32 %v317_v41, %v317_v41 }
 0x106   :  { %v334_v50 = vmul.f32 %v320_v47, %v320_v47 }
 0x108   :  { %339 = vadd.xlane.f32.xlu0 %v333_v49  ;;  %329 = vadd.xlane.f32.xlu1 %v320_v47 }
 0x10c   :  { %341 = vadd.xlane.f32.xlu1 %v334_v50 }
 0x189   :  { %v324_v51 = vpop.xlane.xlu0 %323 }
 0x18b   :  { %v336_v52 = vpop.xlane.xlu1 %335 }
 0x18d   :  { %v326_v53 = vpop.xlane.xlu0 %325 }
 0x18e   :  { %v344_v56 = vadd.f32 %v326_v53, %v324_v51 }
 0x191   :  { %v338_v54 = vpop.xlane.xlu0 %337  ;;  %v328_v55 = vpop.xlane.xlu1 %327 }
 0x192   :  { %v345_v57 = vadd.f32 %v344_v56, %v328_v55  ;;  %v348_v60 = vadd.f32 %v338_v54, %v336_v52 }
 0x195   :  { %v340_v58 = vpop.xlane.xlu0 %339  ;;  %v330_v59 = vpop.xlane.xlu1 %329 }
 0x196   :  { %v346_v61 = vadd.f32 %v345_v57, %v330_v59  ;;  %v349_v62 = vadd.f32 %v348_v60, %v340_v58 }
 0x198   :  { %v351_v63 = vmul.f32 0.001953125, %v346_v61 }
 0x199   :  { %v342_v0 = vpop.xlane.xlu1 %341 }
 0x19a   :  { %v350_v1 = vadd.f32 %v349_v62, %v342_v0  ;;  %v353_v2 = vmul.f32 %v351_v63, %v351_v63 }
 0x19c   :  { %v352_v3 = vmul.f32 0.001953125, %v350_v1 }
 0x19e   :  { %v354_v4 = vsub.f32 %v352_v3, %v353_v2 }
 0x1a0   :  { %v355_v5 = vmax.f32 %v354_v4, 0.0 }
 0x1a2   :  { %v357_v6 = vadd.f32 1e-05, %v355_v5 }
 0x1a4   :  { %464 = vrsqrt.f32 %v357_v6 }
 0x1ae   :  { %v465_v8 = vpop.eup %464 }
 0x1af   :  { %v359_v9 = vmul.f32 %v465_v8, %v356_v7 }
 0x1b1   :  { %365 = vperm.xlu0 %432, %v359_v9   ;;  %v361_v11 = vmul.f32 %v359_v9, %v351_v63 }
 0x1b3   :  { %v362_v12 = vsub.f32 %v360_v10, %v361_v11 }
 0x1b5   :  { %371 = vperm.xlu1 %433, %v362_v12  }
 0x230   :  { %v366_v13 = vpop.permute.xlu0 %365 }
 0x231   :  { %v368_v14 = vmul.f32 %v366_v13, %v309_v30  ;;  %v378_v15 = vmul.f32 %v366_v13, %v312_v35  ;;  %v383_v16 = vmul.f32 %v366_v13, %v317_v41  ;;  %v388_v17 = vmul.f32 %v366_v13, %v320_v47 }
 0x234   :  { %v372_v18 = vpop.permute.xlu1 %371 }
 0x235   :  { %v374_v19 = vadd.f32 %v372_v18, %v368_v14  ;;  %v379_v20 = vadd.f32 %v378_v15, %v372_v18  ;;  %v384_v21 = vadd.f32 %v383_v16, %v372_v18  ;;  %v389_v22 = vadd.f32 %v388_v17, %v372_v18 }
 0x237   :  { %v375_v23 = vmax.f32 %v374_v19, 0.0  ;;  %v380_v24 = vmax.f32 %v379_v20, 0.0  ;;  %v385_v25 = vmax.f32 %v384_v21, 0.0  ;;  %v390_v26 = vmax.f32 %v389_v22, 0.0 }
 0x239   :  { %v376_v27 = vpack.c.bf16 %v375_v23, %v375_v23  ;;  %v381_v28 = vpack.c.bf16 %v380_v24, %v380_v24  ;;  %v386_v29 = vpack.c.bf16 %v385_v25, %v385_v25  ;;  %v391_v31 = vpack.c.bf16 %v390_v26, %v390_v26 }
 0x23b   :  { %377 = vst [vmem:[%s608_s6] sm:$0xf] %v376_v27  ;;  %382 = vst [vmem:[%s608_s6 + $0x4] sm:$0xf] %v381_v28 }
 0x23c   :  { %387 = vst [vmem:[%s608_s6 + $0x8] sm:$0xf] %v386_v29  ;;  %392 = vst [vmem:[%s608_s6 + $0xc] sm:$0xf] %v391_v31 }

// kernel: _lambda_.11
= control target key start
LH: loop header
LB: loop body
LE: loop exit
PB: predicated region body
PF: predicated region fallthrough
CT: control target
= control target key end

     0   :  { %vm41_vm0 = vcmask 1043456   ;;  %v305_v2 = vmov 0   ;;  %vm37_vm1 = vcmask 64512   ;;  %s371_s4 = inlined_call_operand.vmem [shape: bf16[8,512], index: 4, kind: input, shape index: {}]   ;;  %s372_s3 = inlined_call_operand.vmem [shape: bf16[8,512], index: 3, kind: input, shape index: {}]   ;;  %s373_s2 = inlined_call_operand.vmem [shape: f32[3,1], index: 2, kind: input, shape index: {}]   ;;  %s374_s1 = inlined_call_operand.vmem [shape: bf16[3,8], index: 1, kind: input, shape index: {}]   ;;  %s375_s0 = inlined_call_operand.vmem [shape: bf16[3,8], index: 0, kind: input, shape index: {}]   ;;  %s376_s5 = inlined_call_operand.vmem [shape: f32[3,512], index: 5, kind: output, shape index: {}]  }
   0x1   :  { %v25_v0 = vld [vmem:[%s371_s4] sm:$0xff]  ;;  %v26_v1 = vld [vmem:[%s371_s4 + $0x8] sm:$0xff]  ;;  %86 = vmatprep.mubr.bf16.mxu0 %v305_v2  ;;  %127 = vmatprep.mubr.bf16.mxu1 %v305_v2 }
   0x2   :  { %v272_v3 = vcombine.high %v25_v0, %v25_v0  ;;  %v274_v4 = vcombine.high %v26_v1, %v26_v1  ;;  %v271_v5 = vcombine.low %v25_v0, %v25_v0  ;;  %v273_v6 = vcombine.low %v26_v1, %v26_v1  ;;  %v22_v7 = vld [vmem:[%s372_s3] sm:$0xff]  ;;  %v23_v8 = vld [vmem:[%s372_s3 + $0x8] sm:$0xff]  ;;  %288 = vset.pattern.permute.xlu0 %v305_v2 }
   0x3   :  { %v280_v9 = vcombine.high %v22_v7, %v22_v7  ;;  %v282_v10 = vcombine.high %v23_v8, %v23_v8  ;;  %v279_v11 = vcombine.low %v22_v7, %v22_v7  ;;  %v281_v12 = vcombine.low %v23_v8, %v23_v8  ;;  %v243_v15 = vld [vmem:[%s373_s2] sm:$0x7] }
   0x4   :  { %275 = vmatprep.subr.msk.bf16.mxu0 %vm41_vm0, %v272_v3  ;;  %277 = vmatprep.subr.msk.bf16.mxu1 %vm41_vm0, %v274_v4  ;;  %v43_v13 = vsel %vm41_vm0, %v271_v5, 0  ;;  %v49_v14 = vsel %vm41_vm0, %v273_v6, 0  ;;  %v24_v16 = vld [vmem:[%s374_s1] sm:$0x3] }
   0x5   :  { %55 = vmatpush1.bf16.msra.mxu0 %v43_v13  ;;  %96 = vmatpush1.bf16.msra.mxu1 %v49_v14  ;;  %v150_v17 = vsel %vm41_vm0, %v279_v11, 0  ;;  %v156_v18 = vsel %vm41_vm0, %v281_v12, 0  ;;  %v21_v19 = vld [vmem:[%s375_s0] sm:$0x3] }
   0x6   :  { %283 = vmatprep.subr.msk.bf16.mxu0 %vm41_vm0, %v280_v9  ;;  %285 = vmatprep.subr.msk.bf16.mxu1 %vm41_vm0, %v282_v10 }
   0x7   :  { %246 = vperm.xlu0 %288, %v243_v15  }
   0x8   :  { %276 = vmatmul.mubr.msk.bf16.vlgmr.msra.gmra.mrb[0].mxu0 %vm37_vm1, %v24_v16  ;;  %278 = vmatmul.mubr.msk.bf16.vlgmr.msra.gmra.mrb[0].mxu1 %vm37_vm1, %v24_v16 }
   0x9   :  { %162 = vmatpush1.bf16.msra.mxu0 %v150_v17  ;;  %203 = vmatpush1.bf16.msra.mxu1 %v156_v18 }
   0xa   :  { %193 = vmatprep.mubr.bf16.mxu0 %v305_v2  ;;  %234 = vmatprep.mubr.bf16.mxu1 %v305_v2 }
  0x10   :  { %284 = vmatmul.mubr.msk.bf16.vlgmr.msra.gmra.mrb[4].mxu0 %vm37_vm1, %v21_v19  ;;  %286 = vmatmul.mubr.msk.bf16.vlgmr.msra.gmra.mrb[4].mxu1 %vm37_vm1, %v21_v19 }
  0x86   :  { %v247_v28 = vpop.permute.xlu0 %246 }
  0xdb   :  { %v88_v20 = vpop.f32.mrb[0].mxu0  ;;  %v129_v21 = vpop.f32.mrb[0].mxu1 }
  0xdc   :  { %v90_v22 = vpop.f32.mrb[1].mxu0  ;;  %v131_v23 = vpop.f32.mrb[1].mxu1 }
  0xdd   :  { %v92_v24 = vpop.f32.mrb[2].mxu0  ;;  %v133_v25 = vpop.f32.mrb[2].mxu1 }
  0xde   :  { %v93_v26 = vpop.f32.mrb[3].mxu0  ;;  %v134_v27 = vpop.f32.mrb[3].mxu1 }
  0xe3   :  { %v195_v29 = vpop.f32.mrb[4].mxu0  ;;  %v236_v30 = vpop.f32.mrb[4].mxu1 }
  0xe4   :  { %v196_v31 = vadd.f32 %v195_v29, %v88_v20  ;;  %v237_v32 = vadd.f32 %v236_v30, %v129_v21  ;;  %v197_v33 = vpop.f32.mrb[5].mxu0  ;;  %v238_v34 = vpop.f32.mrb[5].mxu1 }
  0xe5   :  { %v198_v35 = vadd.f32 %v197_v33, %v90_v22  ;;  %v239_v36 = vadd.f32 %v238_v34, %v131_v23  ;;  %v199_v37 = vpop.f32.mrb[6].mxu0  ;;  %v240_v38 = vpop.f32.mrb[6].mxu1 }
  0xe6   :  { %v249_v39 = vadd.f32 %v247_v28, %v196_v31  ;;  %v251_v40 = vadd.f32 %v247_v28, %v237_v32  ;;  %v200_v41 = vpop.f32.mrb[7].mxu0  ;;  %v241_v42 = vpop.f32.mrb[7].mxu1 }
  0xe7   :  { %v250_v43 = vadd.f32 %v247_v28, %v198_v35  ;;  %v252_v44 = vadd.f32 %v247_v28, %v239_v36 }
  0xe8   :  { %297 = vtanh.f32 %v249_v39 }
  0xe9   :  { %299 = vtanh.f32 %v250_v43 }
  0xea   :  { %301 = vtanh.f32 %v251_v40 }
  0xeb   :  { %303 = vtanh.f32 %v252_v44 }
  0xf2   :  { %v298_v45 = vpop.eup %297 }
  0xf3   :  { %v300_v46 = vpop.eup %299 }
  0xf4   :  { %v302_v47 = vpop.eup %301  ;;  %v261_v48 = vcombine.low %v298_v45, %v300_v46 }
  0xf5   :  { %v304_v49 = vpop.eup %303 }
  0xf6   :  { %v262_v50 = vcombine.low %v302_v47, %v304_v49  ;;  %265 = vst [vmem:[%s376_s5] sm:$0x77] %v261_v48 }
  0xf8   :  { %266 = vst [vmem:[%s376_s5 + $0x8] sm:$0x77] %v262_v50 }

</bundles_post_ra>
